<compile_context>
chip_gen: v7x
topology: tpu7x:2x2x1
jax: 0.10.0
libtpu: 0.0.40
codegen_flags: <defaults>
</compile_context>

<pallas_src>
import math
from functools import partial

import jax
import jax.numpy as jnp
from jax.experimental import pallas as pl
from jax.experimental.pallas import tpu as pltpu

_VMEM_LIMIT = 48 * 1024 * 1024   # fits v5e/v6e (128 MiB) and v7x (64 MiB) comfortably
_ROW_TARGET = 512                # ~512 rows / pixels per grid step


def _compiler_params(sem):
    return pltpu.CompilerParams(dimension_semantics=sem, vmem_limit_bytes=_VMEM_LIMIT)


def _assert_strides_are_log2_contiguous(strides):
    for i, stride in enumerate(strides[1:], 1):
        assert stride == 2 * strides[i - 1], (
            f"Strides {stride} {strides[i - 1]} are not log2 contiguous")


def _gelu_exact(x):
    # exact (erf) GELU, matching torch.nn.GELU() default
    return 0.5 * x * (1.0 + jax.lax.erf(x * 0.7071067811865476))


def _largest_divisor(n, target, minimum=1):
    target = max(minimum, min(target, n))
    for t in range(target, minimum - 1, -1):
        if n % t == 0:
            return t
    return minimum


def _row_tile(m, target=_ROW_TARGET):
    """Row tile for an (M, K)@(K, N) matmul: full rows if small, else a multiple-of-8 divisor."""
    if m <= target:
        return m
    t0 = target - (target % 8)
    for t in range(t0, 7, -8):
        if m % t == 0:
            return t
    return t0  # ragged last tile; Pallas masks out-of-bounds rows


# ----------------------------------------------------------------------------
# Pallas kernels
# ----------------------------------------------------------------------------
def _matmul_bias_kernel(x_ref, w_ref, b_ref, o_ref, *, activation):
    y = jnp.dot(x_ref[...], w_ref[...], preferred_element_type=jnp.float32)
    y = y + b_ref[...].astype(jnp.float32)
    if activation == "gelu":
        y = _gelu_exact(y)
    o_ref[...] = y.astype(o_ref.dtype)


def _tconv_kernel(x_ref, w0_ref, w1_ref, b_ref, o_ref, *, activation):
    # x: (TH, W, Cin); w0/w1: (Cin, 2*Cout) for output sub-row a=0 / a=1; out: (TH, 2, W, 2*Cout)
    th, wdim, cin = x_ref.shape
    two_co = w0_ref.shape[1]
    x = x_ref[...].reshape(th * wdim, cin)
    b = b_ref[...].astype(jnp.float32)
    y0 = jnp.dot(x, w0_ref[...], preferred_element_type=jnp.float32) + b
    y1 = jnp.dot(x, w1_ref[...], preferred_element_type=jnp.float32) + b
    if activation == "gelu":
        y0 = _gelu_exact(y0)
        y1 = _gelu_exact(y1)
    o_ref[:, 0:1, :, :] = y0.reshape(th, 1, wdim, two_co).astype(o_ref.dtype)
    o_ref[:, 1:2, :, :] = y1.reshape(th, 1, wdim, two_co).astype(o_ref.dtype)


def _conv3x3_kernel(*refs, n_shift, th, w_out):
    # refs: n_shift row-shifted input blocks (1, TH, Wp, Cin), weights (3,3,Cin,Cout),
    #       bias (1, Cout), output (1, TH, W, Cout)
    x_refs = refs[:n_shift]
    w_ref = refs[n_shift]
    b_ref = refs[n_shift + 1]
    o_ref = refs[n_shift + 2]
    _, _, wp, cin = x_refs[0].shape
    cout = w_ref.shape[3]
    rows = jnp.concatenate([r[...].reshape(th, wp, cin) for r in x_refs], axis=0)
    acc = jnp.broadcast_to(b_ref[...].astype(jnp.float32), (th * w_out, cout))
    for dw in range(3):
        xw = rows[:, dw:dw + w_out, :]                        # (n_shift*TH, W, Cin)
        for dh in range(3):
            patch = xw[dh:dh + th].reshape(th * w_out, cin)
            acc = acc + jnp.dot(patch, w_ref[dh, dw],
                                preferred_element_type=jnp.float32)
    o_ref[...] = acc.reshape(1, th, w_out, cout).astype(o_ref.dtype)


def _maxpool_kernel(x_ref, o_ref):
    _, th2, wdim, c = x_ref.shape
    tr = th2 // 2
    wo = wdim // 2
    x = x_ref[...].reshape(tr, 2, wdim, c)
    m = jnp.max(x, axis=1)                                    # vertical 2-max
    m = m.reshape(tr, wo, 2, c)
    o_ref[...] = jnp.max(m, axis=2).reshape(1, tr, wo, c)     # horizontal 2-max


# ----------------------------------------------------------------------------
# Kernel wrappers
# ----------------------------------------------------------------------------
def matmul_bias(x, w, b, activation=None):
    """y = x @ w + b (+ optional exact GELU). Used for 1x1 convolutions."""
    m, k = x.shape
    nout = w.shape[1]
    tm = _row_tile(m)
    gelu = activation == "gelu"
    out = pl.pallas_call(
        partial(_matmul_bias_kernel, activation=activation),
        out_shape=jax.ShapeDtypeStruct((m, nout), x.dtype),
        grid=(pl.cdiv(m, tm),),
        in_specs=[
            pl.BlockSpec((tm, k), lambda i: (i, 0)),
            pl.BlockSpec((k, nout), lambda i: (0, 0)),
            pl.BlockSpec((1, nout), lambda i: (0, 0)),
        ],
        out_specs=pl.BlockSpec((tm, nout), lambda i: (i, 0)),
        compiler_params=_compiler_params(("parallel",)),
        cost_estimate=pl.CostEstimate(
            flops=2 * m * k * nout,
            transcendentals=(m * nout) if gelu else 0,
            bytes_accessed=4 * (m * k + k * nout + nout + m * nout),
        ),
    )(x, w, b.reshape(1, nout))
    return out


def conv1x1(x_nhwc, w, b):
    """Conv2d(kernel_size=1). w: torch layout (Cout, Cin, 1, 1)."""
    n, h, wdim, cin = x_nhwc.shape
    cout = w.shape[0]
    y = matmul_bias(x_nhwc.reshape(-1, cin), w[:, :, 0, 0].T, b)
    return y.reshape(n, h, wdim, cout)


def conv_transpose2x2(x_nhwc, w, b, activation=None):
    """ConvTranspose2d(kernel_size=2, stride=2). w: torch layout (Cin, Cout, 2, 2).

    The kernel writes an (N*H, 2, W, 2*Cout) buffer whose row-major order equals the
    pixel-shuffled (N, 2H, 2W, Cout) tensor, so the shuffle is a free reshape.
    """
    n, h, wdim, cin = x_nhwc.shape
    cout = w.shape[1]
    wt = jnp.transpose(w, (2, 0, 3, 1))                # (a, ci, b, co)
    w0 = wt[0].reshape(cin, 2 * cout)                  # output sub-row a=0
    w1 = wt[1].reshape(cin, 2 * cout)                  # output sub-row a=1
    b2 = jnp.tile(b, 2).reshape(1, 2 * cout)
    nh = n * h
    x2 = x_nhwc.reshape(nh, wdim, cin)
    th = _largest_divisor(nh, max(1, _ROW_TARGET // max(wdim, 1)))
    gelu = activation == "gelu"
    out = pl.pallas_call(
        partial(_tconv_kernel, activation=activation),
        out_shape=jax.ShapeDtypeStruct((nh, 2, wdim, 2 * cout), x_nhwc.dtype),
        grid=(nh // th,),
        in_specs=[
            pl.BlockSpec((th, wdim, cin), lambda i: (i, 0, 0)),
            pl.BlockSpec((cin, 2 * cout), lambda i: (0, 0)),
            pl.BlockSpec((cin, 2 * cout), lambda i: (0, 0)),
            pl.BlockSpec((1, 2 * cout), lambda i: (0, 0)),
        ],
        out_specs=pl.BlockSpec((th, 2, wdim, 2 * cout), lambda i: (i, 0, 0, 0)),
        compiler_params=_compiler_params(("parallel",)),
        cost_estimate=pl.CostEstimate(
            flops=2 * nh * wdim * cin * 4 * cout,
            transcendentals=(nh * wdim * 4 * cout) if gelu else 0,
            bytes_accessed=4 * (nh * wdim * cin + 4 * cin * cout + 2 * cout
                                + nh * 2 * wdim * 2 * cout),
        ),
    )(x2, w0, w1, b2)
    return out.reshape(n, 2 * h, 2 * wdim, cout)       # free (contiguous) pixel shuffle


def conv3x3(x_nhwc, w, b):
    """Conv2d(kernel_size=3, padding=1), fused halo kernel. w: (Cout, Cin, 3, 3)."""
    n, h, wdim, cin = x_nhwc.shape
    cout = w.shape[0]
    if h % 2 == 0:
        th = _largest_divisor(h, max(2, _ROW_TARGET // max(wdim, 1)), minimum=2)
        n_shift = 2         # two consecutive TH-row blocks cover TH+2 halo rows (TH >= 2)
    else:
        th = 1
        n_shift = 3
    # 1 top halo row + enough bottom zero rows so the shifted blocks stay in bounds.
    pad_bottom = (n_shift - 1) * th - 1
    xp = jnp.pad(x_nhwc, ((0, 0), (1, pad_bottom), (1, 1), (0, 0)))
    wp = wdim + 2
    w_t = jnp.transpose(w, (2, 3, 1, 0))               # (dh, dw, Cin, Cout)
    b2 = b.reshape(1, cout)

    in_specs = [
        pl.BlockSpec((1, th, wp, cin), (lambda ni, ti, s=s: (ni, ti + s, 0, 0)))
        for s in range(n_shift)
    ]
    in_specs += [
        pl.BlockSpec((3, 3, cin, cout), lambda ni, ti: (0, 0, 0, 0)),
        pl.BlockSpec((1, cout), lambda ni, ti: (0, 0)),
    ]
    out = pl.pallas_call(
        partial(_conv3x3_kernel, n_shift=n_shift, th=th, w_out=wdim),
        out_shape=jax.ShapeDtypeStruct((n, h, wdim, cout), x_nhwc.dtype),
        grid=(n, h // th),
        in_specs=in_specs,
        out_specs=pl.BlockSpec((1, th, wdim, cout), lambda ni, ti: (ni, ti, 0, 0)),
        compiler_params=_compiler_params(("parallel", "parallel")),
        cost_estimate=pl.CostEstimate(
            flops=2 * n * h * wdim * 9 * cin * cout,
            transcendentals=0,
            bytes_accessed=4 * (n_shift * n * (h + (n_shift - 1) * th) * wp * cin
                                + 9 * cin * cout + cout + n * h * wdim * cout),
        ),
    )(*([xp] * n_shift), w_t, b2)
    return out


def maxpool2x2(x_nhwc):
    """MaxPool2d(kernel_size=2, stride=2) fused over NHWC blocks."""
    n, h, wdim, c = x_nhwc.shape
    ho, wo = h // 2, wdim // 2
    tr = _largest_divisor(ho, max(1, _ROW_TARGET // max(wdim, 1)))
    out = pl.pallas_call(
        _maxpool_kernel,
        out_shape=jax.ShapeDtypeStruct((n, ho, wo, c), x_nhwc.dtype),
        grid=(n, ho // tr),
        in_specs=[pl.BlockSpec((1, 2 * tr, wdim, c), lambda ni, i: (ni, i, 0, 0))],
        out_specs=pl.BlockSpec((1, tr, wo, c), lambda ni, i: (ni, i, 0, 0)),
        compiler_params=_compiler_params(("parallel", "parallel")),
    )(x_nhwc)
    return out


def _merge_tconv_conv1x1(wt, bt, w1, b1):
    """Fold ConvTranspose2d(2,2,s=2) followed by Conv2d(1x1) into one tconv (exact algebra)."""
    w1m = w1[:, :, 0, 0]                               # (Cout, Cmid)
    wm = jnp.einsum("imab,om->ioab", wt, w1m)          # (Cin, Cout, 2, 2)
    bm = w1m @ bt + b1
    return wm, bm


# ----------------------------------------------------------------------------
# SimpleFeaturePyramid port
# ----------------------------------------------------------------------------
def _init_param(key, w_shape, b_shape):
    kw, kb = jax.random.split(key)
    fan_in = 1
    for s in w_shape[1:]:
        fan_in *= s
    scale = 1.0 / math.sqrt(max(fan_in, 1))
    w = jax.random.normal(kw, w_shape, dtype=jnp.float32) * scale
    b = jax.random.normal(kb, b_shape, dtype=jnp.float32) * scale
    return w, b


class SimpleFeaturePyramidPallas:
    """JAX/Pallas port of SimpleFeaturePyramid (norm='', top_block=None)."""

    def __init__(self, input_dim, out_channels, scale_factors, input_stride=16, seed=0):
        dim = input_dim
        self.dim = dim
        self.scale_factors = list(scale_factors)
        strides = [int(input_stride // s) for s in scale_factors]
        _assert_strides_are_log2_contiguous(strides)
        self._out_features = ["p{}".format(int(math.log2(s))) for s in strides]

        key = jax.random.PRNGKey(seed)
        self.stage_params = []
        for scale in scale_factors:
            params = {"tconv": [], "gelu_after": [], "maxpool": False}
            out_dim = dim
            if scale == 4.0:
                key, k1, k2 = jax.random.split(key, 3)
                params["tconv"] = [
                    _init_param(k1, (dim, dim // 2, 2, 2), (dim // 2,)),
                    _init_param(k2, (dim // 2, dim // 4, 2, 2), (dim // 4,)),
                ]
                params["gelu_after"] = [True, False]   # GELU between the two tconvs
                out_dim = dim // 4
            elif scale == 2.0:
                key, k1 = jax.random.split(key)
                params["tconv"] = [_init_param(k1, (dim, dim // 2, 2, 2), (dim // 2,))]
                params["gelu_after"] = [False]
                out_dim = dim // 2
            elif scale == 1.0:
                pass
            elif scale == 0.5:
                params["maxpool"] = True
            else:
                raise NotImplementedError(f"scale_factor={scale} is not supported yet.")
            key, k1, k2 = jax.random.split(key, 3)
            params["conv1x1"] = _init_param(k1, (out_channels, out_dim, 1, 1), (out_channels,))
            params["conv3x3"] = _init_param(k2, (out_channels, out_channels, 3, 3), (out_channels,))
            self.stage_params.append((scale, params))

    def __call__(self, x):
        feats = x["last_feat"]                          # NCHW, like the PyTorch module
        feats_nhwc = jnp.transpose(feats, (0, 2, 3, 1))
        results = []
        for scale, p in self.stage_params:
            y = feats_nhwc
            if p["maxpool"]:
                y = maxpool2x2(y)
            tconvs, gelus = p["tconv"], p["gelu_after"]
            w1, b1 = p["conv1x1"]
            # Fold the 1x1 conv into the last tconv when no GELU separates them (exact algebra).
            fold = len(tconvs) > 0 and not gelus[-1]
            n_apply = len(tconvs) - 1 if fold else len(tconvs)
            for (w, b), g in zip(tconvs[:n_apply], gelus[:n_apply]):
                y = conv_transpose2x2(y, w, b, activation="gelu" if g else None)
            if fold:
                wt, bt = tconvs[-1]
                wm, bm = _merge_tconv_conv1x1(wt, bt, w1, b1)
                y = conv_transpose2x2(y, wm, bm)
            else:
                y = conv1x1(y, w1, b1)
            w3, b3 = p["conv3x3"]
            y = conv3x3(y, w3, b3)
            results.append(jnp.transpose(y, (0, 3, 1, 2)))   # back to NCHW
        return {f: r for f, r in zip(self._out_features, results)}


# ----------------------------------------------------------------------------
# Pure-JAX reference (unfused, mirrors the PyTorch module) for validation
# ----------------------------------------------------------------------------
def _ref_conv_transpose2x2(x, w, b):
    n, h, ww, cin = x.shape
    cout = w.shape[1]
    y = jnp.einsum("nhwi,ioab->nhwabo", x, w) + b
    y = y.transpose(0, 1, 3, 2, 4, 5).reshape(n, 2 * h, 2 * ww, cout)
    return y


def _ref_conv1x1(x, w, b):
    return jnp.einsum("nhwi,oi->nhwo", x, w[:, :, 0, 0]) + b


def _ref_conv3x3(x, w, b):
    n, h, ww, cin = x.shape
    xp = jnp.pad(x, ((0, 0), (1, 1), (1, 1), (0, 0)))
    acc = jnp.zeros((n, h, ww, w.shape[0]), jnp.float32)
    for dh in range(3):
        for dw in range(3):
            acc = acc + jnp.einsum("nhwi,oi->nhwo",
                                   xp[:, dh:dh + h, dw:dw + ww, :], w[:, :, dh, dw])
    return acc + b


def _ref_maxpool(x):
    n, h, w, c = x.shape
    return jnp.max(x.reshape(n, h // 2, 2, w // 2, 2, c), axis=(2, 4))


def _reference_forward(fpn, x_nchw):
    y0 = jnp.transpose(x_nchw, (0, 2, 3, 1))
    results = {}
    for name, (scale, p) in zip(fpn._out_features, fpn.stage_params):
        y = y0
        if p["maxpool"]:
            y = _ref_maxpool(y)
        for (w, b), g in zip(p["tconv"], p["gelu_after"]):
            y = _ref_conv_transpose2x2(y, w, b)
            if g:
                y = _gelu_exact(y)
        w, b = p["conv1x1"]
        y = _ref_conv1x1(y, w, b)
        w, b = p["conv3x3"]
        y = _ref_conv3x3(y, w, b)
        results[name] = jnp.transpose(y, (0, 3, 1, 2))
    return results


if __name__ == "__main__":
    key = jax.random.PRNGKey(0)
    N, C, H, W = 2, 16, 16, 16               # input_dim=16 so dim//4 = 4
    out_channels = 32
    x = jax.random.normal(key, (N, C, H, W), dtype=jnp.float32)

    fpn = SimpleFeaturePyramidPallas(
        input_dim=C,
        out_channels=out_channels,
        scale_factors=(4.0, 2.0, 1.0, 0.5),
        input_stride=16,
        seed=0,
    )
    out = fpn({"last_feat": x})
    out = jax.block_until_ready(out)

    expected = {
        "p2": (N, out_channels, 4 * H, 4 * W),
        "p3": (N, out_channels, 2 * H, 2 * W),
        "p4": (N, out_channels, H, W),
        "p5": (N, out_channels, H // 2, W // 2),
    }
    for k, shp in expected.items():
        assert out[k].shape == shp, (k, out[k].shape, shp)
        assert out[k].dtype == jnp.float32
        assert bool(jnp.all(jnp.isfinite(out[k]))), k

    ref = _reference_forward(fpn, x)
    for k in expected:
        assert bool(jnp.allclose(out[k], ref[k], rtol=5e-2, atol=5e-2)), k

    print("KERNEL_OK")
</pallas_src>

<mosaic_0001>
module attributes {stable_mosaic.version = 11 : i64} {
  func.func @_tconv_kernel(%arg0: i32, %arg1: memref<32x16x16xf32, #tpu.memory_space<vmem>>, %arg2: memref<16x16xf32, #tpu.memory_space<vmem>>, %arg3: memref<16x16xf32, #tpu.memory_space<vmem>>, %arg4: memref<1x16xf32, #tpu.memory_space<vmem>>, %arg5: memref<32x2x16x16xf32, #tpu.memory_space<vmem>>) attributes {dimension_semantics = [#tpu.dimension_semantics<parallel>], iteration_bounds = array<i64: 1>, scalar_prefetch = 0 : i64, scratch_operands = 0 : i64, tpu.core_type = #tpu.core_type<tc>, window_params = [{transform_indices = @transform_0, window_bounds = array<i64: 32, 16, 16>}, {pipeline_mode = #tpu.pipeline_mode<synchronous>, transform_indices = @transform_1, window_bounds = array<i64: 16, 16>}, {pipeline_mode = #tpu.pipeline_mode<synchronous>, transform_indices = @transform_2, window_bounds = array<i64: 16, 16>}, {pipeline_mode = #tpu.pipeline_mode<synchronous>, transform_indices = @transform_3, window_bounds = array<i64: 1, 16>}, {transform_indices = @transform_4, window_bounds = array<i64: 32, 2, 16, 16>}]} {
    %c0 = arith.constant 0 : index
    %c0_0 = arith.constant 0 : index
    %c0_1 = arith.constant 0 : index
    %0 = vector.load %arg1[%c0, %c0_0, %c0_1] : memref<32x16x16xf32, #tpu.memory_space<vmem>>, vector<32x16x16xf32>
    %1 = vector.shape_cast %0 : vector<32x16x16xf32> to vector<512x16xf32>
    %c0_2 = arith.constant 0 : index
    %c0_3 = arith.constant 0 : index
    %2 = vector.load %arg4[%c0_2, %c0_3] : memref<1x16xf32, #tpu.memory_space<vmem>>, vector<1x16xf32>
    %c0_4 = arith.constant 0 : index
    %c0_5 = arith.constant 0 : index
    %3 = vector.load %arg2[%c0_4, %c0_5] : memref<16x16xf32, #tpu.memory_space<vmem>>, vector<16x16xf32>
    %cst = arith.constant dense<0.000000e+00> : vector<512x16xf32>
    %4 = tpu.matmul %1, %3, %cst {dimension_numbers = #tpu.dot_dimension_numbers<[1], [0], [0], [1], [0, 0, 1, 1], [], []>} : vector<512x16xf32>, vector<16x16xf32>, vector<512x16xf32> -> vector<512x16xf32>
    %5 = vector.broadcast %2 : vector<1x16xf32> to vector<512x16xf32>
    %6 = arith.addf %4, %5 : vector<512x16xf32>
    %c0_6 = arith.constant 0 : index
    %c0_7 = arith.constant 0 : index
    %7 = vector.load %arg3[%c0_6, %c0_7] : memref<16x16xf32, #tpu.memory_space<vmem>>, vector<16x16xf32>
    %cst_8 = arith.constant dense<0.000000e+00> : vector<512x16xf32>
    %8 = tpu.matmul %1, %7, %cst_8 {dimension_numbers = #tpu.dot_dimension_numbers<[1], [0], [0], [1], [0, 0, 1, 1], [], []>} : vector<512x16xf32>, vector<16x16xf32>, vector<512x16xf32> -> vector<512x16xf32>
    %9 = vector.broadcast %2 : vector<1x16xf32> to vector<512x16xf32>
    %10 = arith.addf %8, %9 : vector<512x16xf32>
    %cst_9 = arith.constant 5.000000e-01 : f32
    %11 = vector.broadcast %cst_9 : f32 to vector<512x16xf32>
    %12 = arith.mulf %11, %6 : vector<512x16xf32>
    %cst_10 = arith.constant 0.707106769 : f32
    %13 = vector.broadcast %cst_10 : f32 to vector<512x16xf32>
    %14 = arith.mulf %6, %13 : vector<512x16xf32>
    %15 = math.erf %14 : vector<512x16xf32>
    %cst_11 = arith.constant 1.000000e+00 : f32
    %16 = vector.broadcast %cst_11 : f32 to vector<512x16xf32>
    %17 = arith.addf %16, %15 : vector<512x16xf32>
    %18 = arith.mulf %12, %17 : vector<512x16xf32>
    %cst_12 = arith.constant 5.000000e-01 : f32
    %19 = vector.broadcast %cst_12 : f32 to vector<512x16xf32>
    %20 = arith.mulf %19, %10 : vector<512x16xf32>
    %cst_13 = arith.constant 0.707106769 : f32
    %21 = vector.broadcast %cst_13 : f32 to vector<512x16xf32>
    %22 = arith.mulf %10, %21 : vector<512x16xf32>
    %23 = math.erf %22 : vector<512x16xf32>
    %cst_14 = arith.constant 1.000000e+00 : f32
    %24 = vector.broadcast %cst_14 : f32 to vector<512x16xf32>
    %25 = arith.addf %24, %23 : vector<512x16xf32>
    %26 = arith.mulf %20, %25 : vector<512x16xf32>
    %27 = vector.shape_cast %18 : vector<512x16xf32> to vector<32x1x16x16xf32>
    %c0_15 = arith.constant 0 : index
    %c0_16 = arith.constant 0 : index
    %c0_17 = arith.constant 0 : index
    %c0_18 = arith.constant 0 : index
    %28 = vector.load %arg5[%c0_15, %c0_16, %c0_17, %c0_18] : memref<32x2x16x16xf32, #tpu.memory_space<vmem>>, vector<32x1x16x16xf32>
    tpu.vector_store %arg5[%c0_15, %c0_16, %c0_17, %c0_18], %27 {strides = array<i32>} : memref<32x2x16x16xf32, #tpu.memory_space<vmem>>, vector<32x1x16x16xf32>,
    %29 = vector.shape_cast %26 : vector<512x16xf32> to vector<32x1x16x16xf32>
    %c0_19 = arith.constant 0 : index
    %c1 = arith.constant 1 : index
    %c0_20 = arith.constant 0 : index
    %c0_21 = arith.constant 0 : index
    %30 = vector.load %arg5[%c0_19, %c1, %c0_20, %c0_21] : memref<32x2x16x16xf32, #tpu.memory_space<vmem>>, vector<32x1x16x16xf32>
    tpu.vector_store %arg5[%c0_19, %c1, %c0_20, %c0_21], %29 {strides = array<i32>} : memref<32x2x16x16xf32, #tpu.memory_space<vmem>>, vector<32x1x16x16xf32>,
    return
  }
  func.func @transform_0(%arg0: i32) -> (i32, i32, i32) {
    %c0_i32 = arith.constant 0 : i32
    %c0_i32_0 = arith.constant 0 : i32
    %c0_i32_1 = arith.constant 0 : i32
    return %arg0, %c0_i32, %c0_i32_0 : i32, i32, i32
  }
  func.func @transform_1(%arg0: i32) -> (i32, i32) {
    %c0_i32 = arith.constant 0 : i32
    %c0_i32_0 = arith.constant 0 : i32
    %c0_i32_1 = arith.constant 0 : i32
    return %c0_i32, %c0_i32_0 : i32, i32
  }
  func.func @transform_2(%arg0: i32) -> (i32, i32) {
    %c0_i32 = arith.constant 0 : i32
    %c0_i32_0 = arith.constant 0 : i32
    %c0_i32_1 = arith.constant 0 : i32
    return %c0_i32, %c0_i32_0 : i32, i32
  }
  func.func @transform_3(%arg0: i32) -> (i32, i32) {
    %c0_i32 = arith.constant 0 : i32
    %c0_i32_0 = arith.constant 0 : i32
    %c0_i32_1 = arith.constant 0 : i32
    return %c0_i32, %c0_i32_0 : i32, i32
  }
  func.func @transform_4(%arg0: i32) -> (i32, i32, i32, i32) {
    %c0_i32 = arith.constant 0 : i32
    %c0_i32_0 = arith.constant 0 : i32
    %c0_i32_1 = arith.constant 0 : i32
    %c0_i32_2 = arith.constant 0 : i32
    return %arg0, %c0_i32, %c0_i32_0, %c0_i32_1 : i32, i32, i32, i32
  }
}

</mosaic_0001>

<bundles_post_ra>
// kernel: tpu_custom_call.1
= control target key start
LH: loop header
LB: loop body
LE: loop exit
PB: predicated region body
PF: predicated region fallthrough
CT: control target
= control target key end

     0   :  { %vm90_vm0 = vcmask 130048   ;;  %s4403_s1 = inlined_call_operand.vmem [shape: f32[16,16], index: 1, kind: input, shape index: {}]   ;;  %s4404_s2 = inlined_call_operand.vmem [shape: f32[16,16], index: 2, kind: input, shape index: {}]   ;;  %s4405_s0 = inlined_call_operand.vmem [shape: f32[32,16,16], index: 0, kind: input, shape index: {}]   ;;  %s4406_s3 = inlined_call_operand.vmem [shape: f32[1,16], index: 3, kind: input, shape index: {}]   ;;  %s4407_s4 = inlined_call_operand.vmem [shape: f32[32,2,16,16], index: 4, kind: output, shape index: {}]  }
   0x1   :  { %v82_v0 = vld [vmem:[%s4403_s1] sm:$0xff]  ;;  %v83_v1 = vld [vmem:[%s4403_s1 + $0x8] sm:$0xff]  ;;  %v19_v8 = vld [vmem:[%s4405_s0 + $0x10] sm:$0xff] }
   0x2   :  { %v668_v2 = vld [vmem:[%s4404_s2] sm:$0xff]  ;;  %v2353_v3 = vpack.c.bf16 %v83_v1, %v82_v0  ;;  %v669_v4 = vld [vmem:[%s4404_s2 + $0x8] sm:$0xff]  ;;  %v20_v9 = vld [vmem:[%s4405_s0 + $0x18] sm:$0xff] }
   0x3   :  { %v17_v5 = vld [vmem:[%s4405_s0] sm:$0xff]  ;;  %v2357_v6 = vpack.c.bf16 %v669_v4, %v668_v2  ;;  %v18_v7 = vld [vmem:[%s4405_s0 + $0x8] sm:$0xff]  ;;  %v23_v12 = vld [vmem:[%s4405_s0 + $0x30] sm:$0xff] }
   0x4   :  { %2157 = vmatprep.mubr.msk.f32.mxu0 %vm90_vm0, %v17_v5  ;;  %2257 = vmatprep.mubr.msk.f32.mxu1 %vm90_vm0, %v17_v5  ;;  %v21_v10 = vld [vmem:[%s4405_s0 + $0x20] sm:$0xff]  ;;  %v22_v11 = vld [vmem:[%s4405_s0 + $0x28] sm:$0xff]  ;;  %v24_v13 = vld [vmem:[%s4405_s0 + $0x38] sm:$0xff] }
   0x5   :  { %2354 = vmatprep.subr.bf16.mxu0 %v2353_v3  ;;  %2358 = vmatprep.subr.bf16.mxu1 %v2357_v6  ;;  %v25_v14 = vld [vmem:[%s4405_s0 + $0x40] sm:$0xff]  ;;  %v26_v15 = vld [vmem:[%s4405_s0 + $0x48] sm:$0xff]  ;;  %v27_v16 = vld [vmem:[%s4405_s0 + $0x50] sm:$0xff] }
   0x6   :  { %2356 = vmatpush3.bf16.msra.mxu0 %v2353_v3  ;;  %2360 = vmatpush3.bf16.msra.mxu1 %v2357_v6  ;;  %v28_v17 = vld [vmem:[%s4405_s0 + $0x58] sm:$0xff]  ;;  %v29_v18 = vld [vmem:[%s4405_s0 + $0x60] sm:$0xff]  ;;  %v30_v19 = vld [vmem:[%s4405_s0 + $0x68] sm:$0xff] }
   0x7   :  { %v31_v20 = vld [vmem:[%s4405_s0 + $0x70] sm:$0xff]  ;;  %v32_v21 = vld [vmem:[%s4405_s0 + $0x78] sm:$0xff]  ;;  %v33_v22 = vld [vmem:[%s4405_s0 + $0x80] sm:$0xff] }
   0x8   :  { %v34_v23 = vld [vmem:[%s4405_s0 + $0x88] sm:$0xff]  ;;  %v35_v24 = vld [vmem:[%s4405_s0 + $0x90] sm:$0xff]  ;;  %v36_v25 = vld [vmem:[%s4405_s0 + $0x98] sm:$0xff] }
   0x9   :  { %2158 = vmatmul.mubr.msk.f32.vlgmr.msra.gmra.mrb[0].mxu0 %vm90_vm0, %v18_v7  ;;  %2258 = vmatmul.mubr.msk.f32.vlgmr.msra.gmra.mrb[0].mxu1 %vm90_vm0, %v18_v7  ;;  %v37_v26 = vld [vmem:[%s4405_s0 + $0xa0] sm:$0xff]  ;;  %v38_v27 = vld [vmem:[%s4405_s0 + $0xa8] sm:$0xff]  ;;  %v39_v28 = vld [vmem:[%s4405_s0 + $0xb0] sm:$0xff] }
   0xa   :  { %2160 = vmatprep.mubr.msk.f32.mxu0 %vm90_vm0, %v19_v8  ;;  %2260 = vmatprep.mubr.msk.f32.mxu1 %vm90_vm0, %v19_v8  ;;  %v40_v29 = vld [vmem:[%s4405_s0 + $0xb8] sm:$0xff]  ;;  %v41_v30 = vld [vmem:[%s4405_s0 + $0xc0] sm:$0xff]  ;;  %v42_v31 = vld [vmem:[%s4405_s0 + $0xc8] sm:$0xff] }
   0xb   :  { %v43_v32 = vld [vmem:[%s4405_s0 + $0xd0] sm:$0xff]  ;;  %v44_v33 = vld [vmem:[%s4405_s0 + $0xd8] sm:$0xff]  ;;  %v45_v34 = vld [vmem:[%s4405_s0 + $0xe0] sm:$0xff] }
   0xc   :  { %v46_v35 = vld [vmem:[%s4405_s0 + $0xe8] sm:$0xff]  ;;  %v47_v36 = vld [vmem:[%s4405_s0 + $0xf0] sm:$0xff]  ;;  %v48_v37 = vld [vmem:[%s4405_s0 + $0xf8] sm:$0xff] }
   0xd   :  { %2161 = vmatmul.mubr.msk.f32.gmra.mrb[2].mxu0 %vm90_vm0, %v20_v9  ;;  %2261 = vmatmul.mubr.msk.f32.gmra.mrb[2].mxu1 %vm90_vm0, %v20_v9  ;;  %v49_v38 = vld [vmem:[%s4405_s0 + $0x100] sm:$0xff]  ;;  %v50_v39 = vld [vmem:[%s4405_s0 + $0x108] sm:$0xff]  ;;  %v51_v40 = vld [vmem:[%s4405_s0 + $0x110] sm:$0xff] }
   0xe   :  { %2163 = vmatprep.mubr.msk.f32.mxu0 %vm90_vm0, %v21_v10  ;;  %2263 = vmatprep.mubr.msk.f32.mxu1 %vm90_vm0, %v21_v10  ;;  %v52_v41 = vld [vmem:[%s4405_s0 + $0x118] sm:$0xff]  ;;  %v53_v42 = vld [vmem:[%s4405_s0 + $0x120] sm:$0xff]  ;;  %v54_v43 = vld [vmem:[%s4405_s0 + $0x128] sm:$0xff] }
   0xf   :  { %v55_v44 = vld [vmem:[%s4405_s0 + $0x130] sm:$0xff]  ;;  %v56_v45 = vld [vmem:[%s4405_s0 + $0x138] sm:$0xff]  ;;  %v57_v46 = vld [vmem:[%s4405_s0 + $0x140] sm:$0xff] }
  0x10   :  { %v58_v47 = vld [vmem:[%s4405_s0 + $0x148] sm:$0xff]  ;;  %v59_v48 = vld [vmem:[%s4405_s0 + $0x150] sm:$0xff]  ;;  %v60_v49 = vld [vmem:[%s4405_s0 + $0x158] sm:$0xff] }
  0x11   :  { %2164 = vmatmul.mubr.msk.f32.gmra.mrb[4].mxu0 %vm90_vm0, %v22_v11  ;;  %2264 = vmatmul.mubr.msk.f32.gmra.mrb[4].mxu1 %vm90_vm0, %v22_v11  ;;  %v61_v50 = vld [vmem:[%s4405_s0 + $0x160] sm:$0xff]  ;;  %v62_v51 = vld [vmem:[%s4405_s0 + $0x168] sm:$0xff]  ;;  %v63_v52 = vld [vmem:[%s4405_s0 + $0x170] sm:$0xff] }
  0x12   :  { %2166 = vmatprep.mubr.msk.f32.mxu0 %vm90_vm0, %v23_v12  ;;  %2266 = vmatprep.mubr.msk.f32.mxu1 %vm90_vm0, %v23_v12  ;;  %v64_v53 = vld [vmem:[%s4405_s0 + $0x178] sm:$0xff]  ;;  %v65_v54 = vld [vmem:[%s4405_s0 + $0x180] sm:$0xff]  ;;  %v66_v55 = vld [vmem:[%s4405_s0 + $0x188] sm:$0xff] }
  0x13   :  { %v67_v56 = vld [vmem:[%s4405_s0 + $0x190] sm:$0xff]  ;;  %v68_v57 = vld [vmem:[%s4405_s0 + $0x198] sm:$0xff]  ;;  %v69_v58 = vld [vmem:[%s4405_s0 + $0x1a0] sm:$0xff] }
  0x14   :  { %v70_v59 = vld [vmem:[%s4405_s0 + $0x1a8] sm:$0xff]  ;;  %v71_v60 = vld [vmem:[%s4405_s0 + $0x1b0] sm:$0xff]  ;;  %v72_v61 = vld [vmem:[%s4405_s0 + $0x1b8] sm:$0xff] }
  0x15   :  { %2167 = vmatmul.mubr.msk.f32.gmra.mrb[6].mxu0 %vm90_vm0, %v24_v13  ;;  %2267 = vmatmul.mubr.msk.f32.gmra.mrb[6].mxu1 %vm90_vm0, %v24_v13  ;;  %v73_v62 = vld [vmem:[%s4405_s0 + $0x1c0] sm:$0xff]  ;;  %v74_v63 = vld [vmem:[%s4405_s0 + $0x1c8] sm:$0xff]  ;;  %v75_v0 = vld [vmem:[%s4405_s0 + $0x1d0] sm:$0xff] }
  0x16   :  { %2169 = vmatprep.mubr.msk.f32.mxu0 %vm90_vm0, %v25_v14  ;;  %2269 = vmatprep.mubr.msk.f32.mxu1 %vm90_vm0, %v25_v14  ;;  %v76_v1 = vld [vmem:[%s4405_s0 + $0x1d8] sm:$0xff]  ;;  %v77_v2 = vld [vmem:[%s4405_s0 + $0x1e0] sm:$0xff]  ;;  %v78_v3 = vld [vmem:[%s4405_s0 + $0x1e8] sm:$0xff] }
  0x17   :  { %v79_v4 = vld [vmem:[%s4405_s0 + $0x1f0] sm:$0xff]  ;;  %v80_v5 = vld [vmem:[%s4405_s0 + $0x1f8] sm:$0xff]  ;;  %v2979_v6 = vld [vmem:[%s4406_s3] ss:$0 sm:$0xff] }
  0x19   :  { %2170 = vmatmul.mubr.msk.f32.gmra.mrb[8].mxu0 %vm90_vm0, %v26_v15  ;;  %2270 = vmatmul.mubr.msk.f32.gmra.mrb[8].mxu1 %vm90_vm0, %v26_v15 }
  0x1a   :  { %2172 = vmatprep.mubr.msk.f32.mxu0 %vm90_vm0, %v27_v16  ;;  %2272 = vmatprep.mubr.msk.f32.mxu1 %vm90_vm0, %v27_v16 }
  0x1d   :  { %2173 = vmatmul.mubr.msk.f32.gmra.mrb[10].mxu0 %vm90_vm0, %v28_v17  ;;  %2273 = vmatmul.mubr.msk.f32.gmra.mrb[10].mxu1 %vm90_vm0, %v28_v17 }
  0x1e   :  { %2175 = vmatprep.mubr.msk.f32.mxu0 %vm90_vm0, %v29_v18  ;;  %2275 = vmatprep.mubr.msk.f32.mxu1 %vm90_vm0, %v29_v18 }
  0x21   :  { %2176 = vmatmul.mubr.msk.f32.gmra.mrb[12].mxu0 %vm90_vm0, %v30_v19  ;;  %2276 = vmatmul.mubr.msk.f32.gmra.mrb[12].mxu1 %vm90_vm0, %v30_v19 }
  0x22   :  { %2178 = vmatprep.mubr.msk.f32.mxu0 %vm90_vm0, %v31_v20  ;;  %2278 = vmatprep.mubr.msk.f32.mxu1 %vm90_vm0, %v31_v20 }
  0x25   :  { %2179 = vmatmul.mubr.msk.f32.gmra.mrb[14].mxu0 %vm90_vm0, %v32_v21  ;;  %2279 = vmatmul.mubr.msk.f32.gmra.mrb[14].mxu1 %vm90_vm0, %v32_v21 }
  0x26   :  { %2181 = vmatprep.mubr.msk.f32.mxu0 %vm90_vm0, %v33_v22  ;;  %2281 = vmatprep.mubr.msk.f32.mxu1 %vm90_vm0, %v33_v22 }
  0x29   :  { %2182 = vmatmul.mubr.msk.f32.gmra.mrb[16].mxu0 %vm90_vm0, %v34_v23  ;;  %2282 = vmatmul.mubr.msk.f32.gmra.mrb[16].mxu1 %vm90_vm0, %v34_v23 }
  0x2a   :  { %2184 = vmatprep.mubr.msk.f32.mxu0 %vm90_vm0, %v35_v24  ;;  %2284 = vmatprep.mubr.msk.f32.mxu1 %vm90_vm0, %v35_v24 }
  0x2d   :  { %2185 = vmatmul.mubr.msk.f32.gmra.mrb[18].mxu0 %vm90_vm0, %v36_v25  ;;  %2285 = vmatmul.mubr.msk.f32.gmra.mrb[18].mxu1 %vm90_vm0, %v36_v25 }
  0x2e   :  { %2187 = vmatprep.mubr.msk.f32.mxu0 %vm90_vm0, %v37_v26  ;;  %2287 = vmatprep.mubr.msk.f32.mxu1 %vm90_vm0, %v37_v26 }
  0x31   :  { %2188 = vmatmul.mubr.msk.f32.gmra.mrb[20].mxu0 %vm90_vm0, %v38_v27  ;;  %2288 = vmatmul.mubr.msk.f32.gmra.mrb[20].mxu1 %vm90_vm0, %v38_v27 }
  0x32   :  { %2190 = vmatprep.mubr.msk.f32.mxu0 %vm90_vm0, %v39_v28  ;;  %2290 = vmatprep.mubr.msk.f32.mxu1 %vm90_vm0, %v39_v28 }
  0x35   :  { %2191 = vmatmul.mubr.msk.f32.gmra.mrb[22].mxu0 %vm90_vm0, %v40_v29  ;;  %2291 = vmatmul.mubr.msk.f32.gmra.mrb[22].mxu1 %vm90_vm0, %v40_v29 }
  0x36   :  { %2193 = vmatprep.mubr.msk.f32.mxu0 %vm90_vm0, %v41_v30  ;;  %2293 = vmatprep.mubr.msk.f32.mxu1 %vm90_vm0, %v41_v30 }
  0x39   :  { %2194 = vmatmul.mubr.msk.f32.gmra.mrb[24].mxu0 %vm90_vm0, %v42_v31  ;;  %2294 = vmatmul.mubr.msk.f32.gmra.mrb[24].mxu1 %vm90_vm0, %v42_v31 }
  0x3a   :  { %2196 = vmatprep.mubr.msk.f32.mxu0 %vm90_vm0, %v43_v32  ;;  %2296 = vmatprep.mubr.msk.f32.mxu1 %vm90_vm0, %v43_v32 }
  0x3d   :  { %2197 = vmatmul.mubr.msk.f32.gmra.mrb[26].mxu0 %vm90_vm0, %v44_v33  ;;  %2297 = vmatmul.mubr.msk.f32.gmra.mrb[26].mxu1 %vm90_vm0, %v44_v33 }
  0x3e   :  { %2199 = vmatprep.mubr.msk.f32.mxu0 %vm90_vm0, %v45_v34  ;;  %2299 = vmatprep.mubr.msk.f32.mxu1 %vm90_vm0, %v45_v34 }
  0x41   :  { %2200 = vmatmul.mubr.msk.f32.gmra.mrb[28].mxu0 %vm90_vm0, %v46_v35  ;;  %2300 = vmatmul.mubr.msk.f32.gmra.mrb[28].mxu1 %vm90_vm0, %v46_v35 }
  0x42   :  { %2202 = vmatprep.mubr.msk.f32.mxu0 %vm90_vm0, %v47_v36  ;;  %2302 = vmatprep.mubr.msk.f32.mxu1 %vm90_vm0, %v47_v36 }
  0x45   :  { %2203 = vmatmul.mubr.msk.f32.gmra.mrb[30].mxu0 %vm90_vm0, %v48_v37  ;;  %2303 = vmatmul.mubr.msk.f32.gmra.mrb[30].mxu1 %vm90_vm0, %v48_v37 }
  0x46   :  { %2205 = vmatprep.mubr.msk.f32.mxu0 %vm90_vm0, %v49_v38  ;;  %2305 = vmatprep.mubr.msk.f32.mxu1 %vm90_vm0, %v49_v38 }
  0x49   :  { %2206 = vmatmul.mubr.msk.f32.gmra.mrb[32].mxu0 %vm90_vm0, %v50_v39  ;;  %2306 = vmatmul.mubr.msk.f32.gmra.mrb[32].mxu1 %vm90_vm0, %v50_v39 }
  0x4a   :  { %2208 = vmatprep.mubr.msk.f32.mxu0 %vm90_vm0, %v51_v40  ;;  %2308 = vmatprep.mubr.msk.f32.mxu1 %vm90_vm0, %v51_v40 }
  0x4d   :  { %2209 = vmatmul.mubr.msk.f32.gmra.mrb[34].mxu0 %vm90_vm0, %v52_v41  ;;  %2309 = vmatmul.mubr.msk.f32.gmra.mrb[34].mxu1 %vm90_vm0, %v52_v41 }
  0x4e   :  { %2211 = vmatprep.mubr.msk.f32.mxu0 %vm90_vm0, %v53_v42  ;;  %2311 = vmatprep.mubr.msk.f32.mxu1 %vm90_vm0, %v53_v42 }
  0x51   :  { %2212 = vmatmul.mubr.msk.f32.gmra.mrb[36].mxu0 %vm90_vm0, %v54_v43  ;;  %2312 = vmatmul.mubr.msk.f32.gmra.mrb[36].mxu1 %vm90_vm0, %v54_v43 }
  0x52   :  { %2214 = vmatprep.mubr.msk.f32.mxu0 %vm90_vm0, %v55_v44  ;;  %2314 = vmatprep.mubr.msk.f32.mxu1 %vm90_vm0, %v55_v44 }
  0x55   :  { %2215 = vmatmul.mubr.msk.f32.gmra.mrb[38].mxu0 %vm90_vm0, %v56_v45  ;;  %2315 = vmatmul.mubr.msk.f32.gmra.mrb[38].mxu1 %vm90_vm0, %v56_v45 }
  0x56   :  { %2217 = vmatprep.mubr.msk.f32.mxu0 %vm90_vm0, %v57_v46  ;;  %2317 = vmatprep.mubr.msk.f32.mxu1 %vm90_vm0, %v57_v46 }
  0x59   :  { %2218 = vmatmul.mubr.msk.f32.gmra.mrb[40].mxu0 %vm90_vm0, %v58_v47  ;;  %2318 = vmatmul.mubr.msk.f32.gmra.mrb[40].mxu1 %vm90_vm0, %v58_v47 }
  0x5a   :  { %2220 = vmatprep.mubr.msk.f32.mxu0 %vm90_vm0, %v59_v48  ;;  %2320 = vmatprep.mubr.msk.f32.mxu1 %vm90_vm0, %v59_v48 }
  0x5d   :  { %2221 = vmatmul.mubr.msk.f32.gmra.mrb[42].mxu0 %vm90_vm0, %v60_v49  ;;  %2321 = vmatmul.mubr.msk.f32.gmra.mrb[42].mxu1 %vm90_vm0, %v60_v49 }
  0x5e   :  { %2223 = vmatprep.mubr.msk.f32.mxu0 %vm90_vm0, %v61_v50  ;;  %2323 = vmatprep.mubr.msk.f32.mxu1 %vm90_vm0, %v61_v50 }
  0x61   :  { %2224 = vmatmul.mubr.msk.f32.gmra.mrb[44].mxu0 %vm90_vm0, %v62_v51  ;;  %2324 = vmatmul.mubr.msk.f32.gmra.mrb[44].mxu1 %vm90_vm0, %v62_v51 }
  0x62   :  { %2226 = vmatprep.mubr.msk.f32.mxu0 %vm90_vm0, %v63_v52  ;;  %2326 = vmatprep.mubr.msk.f32.mxu1 %vm90_vm0, %v63_v52 }
  0x65   :  { %2227 = vmatmul.mubr.msk.f32.gmra.mrb[46].mxu0 %vm90_vm0, %v64_v53  ;;  %2327 = vmatmul.mubr.msk.f32.gmra.mrb[46].mxu1 %vm90_vm0, %v64_v53 }
  0x66   :  { %2229 = vmatprep.mubr.msk.f32.mxu0 %vm90_vm0, %v65_v54  ;;  %2329 = vmatprep.mubr.msk.f32.mxu1 %vm90_vm0, %v65_v54 }
  0x69   :  { %2230 = vmatmul.mubr.msk.f32.gmra.mrb[48].mxu0 %vm90_vm0, %v66_v55  ;;  %2330 = vmatmul.mubr.msk.f32.gmra.mrb[48].mxu1 %vm90_vm0, %v66_v55 }
  0x6a   :  { %2232 = vmatprep.mubr.msk.f32.mxu0 %vm90_vm0, %v67_v56  ;;  %2332 = vmatprep.mubr.msk.f32.mxu1 %vm90_vm0, %v67_v56 }
  0x6d   :  { %2233 = vmatmul.mubr.msk.f32.gmra.mrb[50].mxu0 %vm90_vm0, %v68_v57  ;;  %2333 = vmatmul.mubr.msk.f32.gmra.mrb[50].mxu1 %vm90_vm0, %v68_v57 }
  0x6e   :  { %2235 = vmatprep.mubr.msk.f32.mxu0 %vm90_vm0, %v69_v58  ;;  %2335 = vmatprep.mubr.msk.f32.mxu1 %vm90_vm0, %v69_v58 }
  0x71   :  { %2236 = vmatmul.mubr.msk.f32.gmra.mrb[52].mxu0 %vm90_vm0, %v70_v59  ;;  %2336 = vmatmul.mubr.msk.f32.gmra.mrb[52].mxu1 %vm90_vm0, %v70_v59 }
  0x72   :  { %2238 = vmatprep.mubr.msk.f32.mxu0 %vm90_vm0, %v71_v60  ;;  %2338 = vmatprep.mubr.msk.f32.mxu1 %vm90_vm0, %v71_v60 }
  0x75   :  { %2239 = vmatmul.mubr.msk.f32.gmra.mrb[54].mxu0 %vm90_vm0, %v72_v61  ;;  %2339 = vmatmul.mubr.msk.f32.gmra.mrb[54].mxu1 %vm90_vm0, %v72_v61 }
  0x76   :  { %2241 = vmatprep.mubr.msk.f32.mxu0 %vm90_vm0, %v73_v62  ;;  %2341 = vmatprep.mubr.msk.f32.mxu1 %vm90_vm0, %v73_v62 }
  0x79   :  { %2242 = vmatmul.mubr.msk.f32.gmra.mrb[56].mxu0 %vm90_vm0, %v74_v63  ;;  %2342 = vmatmul.mubr.msk.f32.gmra.mrb[56].mxu1 %vm90_vm0, %v74_v63 }
  0x7a   :  { %2244 = vmatprep.mubr.msk.f32.mxu0 %vm90_vm0, %v75_v0  ;;  %2344 = vmatprep.mubr.msk.f32.mxu1 %vm90_vm0, %v75_v0 }
  0x7d   :  { %2245 = vmatmul.mubr.msk.f32.gmra.mrb[58].mxu0 %vm90_vm0, %v76_v1  ;;  %2345 = vmatmul.mubr.msk.f32.gmra.mrb[58].mxu1 %vm90_vm0, %v76_v1 }
  0x7e   :  { %2247 = vmatprep.mubr.msk.f32.mxu0 %vm90_vm0, %v77_v2  ;;  %2347 = vmatprep.mubr.msk.f32.mxu1 %vm90_vm0, %v77_v2 }
  0x81   :  { %2248 = vmatmul.mubr.msk.f32.gmra.mrb[60].mxu0 %vm90_vm0, %v78_v3  ;;  %2348 = vmatmul.mubr.msk.f32.gmra.mrb[60].mxu1 %vm90_vm0, %v78_v3 }
  0x82   :  { %2250 = vmatprep.mubr.msk.f32.mxu0 %vm90_vm0, %v79_v4  ;;  %2350 = vmatprep.mubr.msk.f32.mxu1 %vm90_vm0, %v79_v4 }
  0x85   :  { %2251 = vmatmul.mubr.msk.f32.gmra.mrb[62].mxu0 %vm90_vm0, %v80_v5  ;;  %2351 = vmatmul.mubr.msk.f32.gmra.mrb[62].mxu1 %vm90_vm0, %v80_v5 }
  0xdc   :  { %v2159_v7 = vpop.f32.mrb[0].mxu0  ;;  %v2259_v9 = vpop.f32.mrb[0].mxu1 }
  0xdd   :  { %v355_v8 = vadd.f32 %v2159_v7, %v2979_v6  ;;  %v349_v10 = vpop.f32.mrb[1].mxu0  ;;  %v742_v11 = vadd.f32 %v2259_v9, %v2979_v6  ;;  %v736_v13 = vpop.f32.mrb[1].mxu1 }
  0xde   :  { %v350_v12 = vadd.f32 %v2979_v6, %v349_v10  ;;  %v737_v15 = vadd.f32 %v2979_v6, %v736_v13 }
  0xdf   :  { %v1120_v14 = vmul.f32 0.70710677, %v355_v8  ;;  %v1440_v16 = vmul.f32 0.70710677, %v742_v11  ;;  %v1056_v38 = vmul.f32 0.5, %v355_v8  ;;  %v1376_v42 = vmul.f32 0.5, %v742_v11 }
  0xe0   :  { %v1119_v17 = vmul.f32 0.70710677, %v350_v12  ;;  %v1439_v18 = vmul.f32 0.70710677, %v737_v15  ;;  %v2162_v19 = vpop.f32.mrb[2].mxu0  ;;  %v2262_v20 = vpop.f32.mrb[2].mxu1 }
  0xe1   :  { %2361 = verf.f32 %v1120_v14  ;;  %v365_v21 = vadd.f32 %v2162_v19, %v2979_v6  ;;  %v752_v22 = vadd.f32 %v2262_v20, %v2979_v6  ;;  %v359_v23 = vpop.f32.mrb[3].mxu0  ;;  %v746_v24 = vpop.f32.mrb[3].mxu1  ;;  %v1055_v43 = vmul.f32 0.5, %v350_v12 }
  0xe2   :  { %2363 = verf.f32 %v1440_v16  ;;  %v360_v25 = vadd.f32 %v2979_v6, %v359_v23  ;;  %v747_v26 = vadd.f32 %v2979_v6, %v746_v24  ;;  %v1375_v47 = vmul.f32 0.5, %v737_v15 }
  0xe3   :  { %2365 = verf.f32 %v1119_v17  ;;  %v1122_v27 = vmul.f32 0.70710677, %v365_v21  ;;  %v1442_v29 = vmul.f32 0.70710677, %v752_v22  ;;  %v1058_v52 = vmul.f32 0.5, %v365_v21 }
  0xe4   :  { %2367 = verf.f32 %v1439_v18  ;;  %v2165_v28 = vpop.f32.mrb[4].mxu0  ;;  %v1121_v30 = vmul.f32 0.70710677, %v360_v25  ;;  %v1441_v31 = vmul.f32 0.70710677, %v747_v26  ;;  %v2265_v33 = vpop.f32.mrb[4].mxu1 }
  0xe5   :  { %2369 = verf.f32 %v1122_v27  ;;  %v375_v32 = vadd.f32 %v2165_v28, %v2979_v6  ;;  %v369_v34 = vpop.f32.mrb[5].mxu0  ;;  %v2991_v35 = vadd.f32 %v2265_v33, %v2979_v6  ;;  %v756_v37 = vpop.f32.mrb[5].mxu1  ;;  %v1378_v57 = vmul.f32 0.5, %v752_v22 }
  0xe6   :  { %2371 = verf.f32 %v1442_v29  ;;  %v2994_v36 = vadd.f32 %v2979_v6, %v369_v34  ;;  %v2997_v40 = vadd.f32 %v2979_v6, %v756_v37  ;;  %v1057_v5 = vmul.f32 0.5, %v360_v25 }
  0xe7   :  { %2373 = verf.f32 %v1121_v30  ;;  %v1124_v39 = vmul.f32 0.70710677, %v375_v32  ;;  %v1444_v44 = vmul.f32 0.70710677, %v2991_v35  ;;  %v1377_v11 = vmul.f32 0.5, %v747_v26 }
  0xe8   :  { %v2168_v41 = vpop.f32.mrb[6].mxu0  ;;  %2375 = verf.f32 %v1441_v31  ;;  %v2268_v45 = vpop.f32.mrb[6].mxu1  ;;  %v1123_v48 = vmul.f32 0.70710677, %v2994_v36  ;;  %v1443_v49 = vmul.f32 0.70710677, %v2997_v40 }
  0xe9   :  { %v379_v46 = vpop.f32.mrb[7].mxu0  ;;  %2377 = verf.f32 %v1124_v39  ;;  %v766_v50 = vpop.f32.mrb[7].mxu1  ;;  %v3003_v53 = vadd.f32 %v2168_v41, %v2979_v6  ;;  %v3006_v54 = vadd.f32 %v2268_v45, %v2979_v6  ;;  %v1060_v14 = vmul.f32 0.5, %v375_v32 }
  0xea   :  { %2379 = verf.f32 %v1444_v44  ;;  %v3009_v58 = vadd.f32 %v2979_v6, %v379_v46  ;;  %v3013_v63 = vadd.f32 %v2979_v6, %v766_v50  ;;  %v1380_v32 = vmul.f32 0.5, %v2991_v35 }
  0xeb   :  { %v2362_v51 = vpop.eup %2361  ;;  %2381 = verf.f32 %v1123_v48  ;;  %v1126_v62 = vmul.f32 0.70710677, %v3003_v53  ;;  %v1446_v7 = vmul.f32 0.70710677, %v3006_v54  ;;  %v1379_v45 = vmul.f32 0.5, %v2997_v40 }
  0xec   :  { %v2364_v55 = vpop.eup %2363  ;;  %v1248_v56 = vadd.f32 1.0, %v2362_v51  ;;  %v2171_v59 = vpop.f32.mrb[8].mxu0  ;;  %2383 = verf.f32 %v1443_v49  ;;  %v1125_v15 = vmul.f32 0.70710677, %v3009_v58  ;;  %v1445_v20 = vmul.f32 0.70710677, %v3013_v63 }
  0xed   :  { %v2366_v60 = vpop.eup %2365  ;;  %v1568_v61 = vadd.f32 1.0, %v2364_v55  ;;  %v2271_v0 = vpop.f32.mrb[8].mxu1  ;;  %2385 = verf.f32 %v1126_v62  ;;  %v3027_v21 = vadd.f32 %v2171_v59, %v2979_v6 }
  0xee   :  { %v389_v1 = vpop.f32.mrb[9].mxu0  ;;  %v2368_v2 = vpop.eup %2367  ;;  %v1312_v3 = vmul.f32 %v1248_v56, %v1056_v38  ;;  %v1247_v4 = vadd.f32 1.0, %v2366_v60  ;;  %2387 = verf.f32 %v1446_v7  ;;  %v3036_v26 = vadd.f32 %v2271_v0, %v2979_v6 }
  0xef   :  { %v776_v8 = vpop.f32.mrb[9].mxu1  ;;  %v1632_v9 = vmul.f32 %v1568_v61, %v1376_v42  ;;  %v1567_v10 = vadd.f32 1.0, %v2368_v2  ;;  %v2370_v12 = vpop.eup %2369  ;;  %2389 = verf.f32 %v1125_v15  ;;  %v3039_v27 = vadd.f32 %v2979_v6, %v389_v1 }
  0xf0   :  { %1696 = vst.msk [vmem:[%s4407_s4 + $0x8] sm:$0xff] %vm90_vm0, %v1312_v3  ;;  %v1311_v13 = vmul.f32 %v1247_v4, %v1055_v43  ;;  %v2174_v16 = vpop.f32.mrb[10].mxu0  ;;  %v2372_v17 = vpop.eup %2371  ;;  %v1250_v19 = vadd.f32 1.0, %v2370_v12  ;;  %2391 = verf.f32 %v1445_v20  ;;  %v1059_v38 = vmul.f32 0.5, %v2994_v36 }
  0xf1   :  { %1958 = vst.msk [vmem:[%s4407_s4 + $0x18] sm:$0xff] %vm90_vm0, %v1632_v9  ;;  %v1631_v18 = vmul.f32 %v1567_v10, %v1375_v47  ;;  %v2274_v22 = vpop.f32.mrb[10].mxu1  ;;  %v3029_v23 = vpop.f32.mrb[11].mxu0  ;;  %v1570_v25 = vadd.f32 1.0, %v2372_v17  ;;  %v1128_v39 = vmul.f32 0.70710677, %v3027_v21  ;;  %v3072_v56 = vadd.f32 %v2979_v6, %v776_v8 }
  0xf2   :  { %v2374_v24 = vpop.eup %2373  ;;  %1695 = vst.msk [vmem:[%s4407_s4] sm:$0xff] %vm90_vm0, %v1311_v13  ;;  %v3041_v28 = vpop.f32.mrb[11].mxu1  ;;  %v1314_v30 = vmul.f32 %v1250_v19, %v1058_v52  ;;  %v1448_v35 = vmul.f32 0.70710677, %v3036_v26  ;;  %v1127_v50 = vmul.f32 0.70710677, %v3039_v27  ;;  %v3079_v60 = vadd.f32 %v2174_v16, %v2979_v6 }
  0xf3   :  { %v2376_v29 = vpop.eup %2375  ;;  %1957 = vst.msk [vmem:[%s4407_s4 + $0x10] sm:$0xff] %vm90_vm0, %v1631_v18  ;;  %v1249_v31 = vadd.f32 1.0, %v2374_v24  ;;  %v1634_v34 = vmul.f32 %v1570_v25, %v1378_v57  ;;  %2393 = verf.f32 %v1128_v39  ;;  %v1062_v1 = vmul.f32 0.5, %v3003_v53 }
  0xf4   :  { %v2378_v33 = vpop.eup %2377  ;;  %v1569_v37 = vadd.f32 1.0, %v2376_v29  ;;  %v2177_v41 = vpop.f32.mrb[12].mxu0  ;;  %1698 = vst.msk [vmem:[%s4407_s4 + $0x28] sm:$0xff] %vm90_vm0, %v1314_v30  ;;  %2395 = verf.f32 %v1448_v35  ;;  %v1447_v2 = vmul.f32 0.70710677, %v3072_v56  ;;  %v3088_v3 = vadd.f32 %v2274_v22, %v2979_v6 }
  0xf5   :  { %v2380_v42 = vpop.eup %2379  ;;  %v1313_v43 = vmul.f32 %v1249_v31, %v1057_v5  ;;  %v1252_v44 = vadd.f32 1.0, %v2378_v33  ;;  %v3056_v46 = vpop.f32.mrb[12].mxu1  ;;  %1960 = vst.msk [vmem:[%s4407_s4 + $0x38] sm:$0xff] %vm90_vm0, %v1634_v34  ;;  %2397 = verf.f32 %v1127_v50  ;;  %v1382_v10 = vmul.f32 0.5, %v3006_v54 }
  0xf6   :  { %v3058_v47 = vpop.f32.mrb[13].mxu0  ;;  %v2382_v36 = vpop.eup %2381  ;;  %v1633_v48 = vmul.f32 %v1569_v37, %v1377_v11  ;;  %v1572_v49 = vadd.f32 1.0, %v2380_v42  ;;  %v1130_v53 = vmul.f32 0.70710677, %v3079_v60  ;;  %v1061_v13 = vmul.f32 0.5, %v3009_v58 }
  0xf7   :  { %v3065_v51 = vpop.f32.mrb[13].mxu1  ;;  %v2384_v40 = vpop.eup %2383  ;;  %1697 = vst.msk [vmem:[%s4407_s4 + $0x20] sm:$0xff] %vm90_vm0, %v1313_v43  ;;  %v1316_v52 = vmul.f32 %v1252_v44, %v1060_v14  ;;  %v1251_v55 = vadd.f32 1.0, %v2382_v36  ;;  %2399 = verf.f32 %v1447_v2  ;;  %v1450_v14 = vmul.f32 0.70710677, %v3088_v3 }
  0xf8   :  { %1959 = vst.msk [vmem:[%s4407_s4 + $0x30] sm:$0xff] %vm90_vm0, %v1633_v48  ;;  %v1636_v57 = vmul.f32 %v1572_v49, %v1380_v32  ;;  %v1571_v59 = vadd.f32 1.0, %v2384_v40  ;;  %v2180_v61 = vpop.f32.mrb[14].mxu0  ;;  %v2386_v62 = vpop.eup %2385  ;;  %2401 = verf.f32 %v1130_v53  ;;  %v3114_v16 = vadd.f32 %v2979_v6, %v3029_v23 }
  0xf9   :  { %1700 = vst.msk [vmem:[%s4407_s4 + $0x48] sm:$0xff] %vm90_vm0, %v1316_v52  ;;  %v1315_v0 = vmul.f32 %v1251_v55, %v1059_v38  ;;  %v3090_v4 = vpop.f32.mrb[14].mxu1  ;;  %v3092_v5 = vpop.f32.mrb[15].mxu0  ;;  %v1254_v9 = vadd.f32 1.0, %v2386_v62  ;;  %v3118_v17 = vadd.f32 %v2979_v6, %v3041_v28  ;;  %2403 = verf.f32 %v1450_v14 }
  0xfa   :  { %v2388_v7 = vpop.eup %2387  ;;  %1962 = vst.msk [vmem:[%s4407_s4 + $0x58] sm:$0xff] %vm90_vm0, %v1636_v57  ;;  %v1635_v8 = vmul.f32 %v1571_v59, %v1379_v45  ;;  %v3100_v11 = vpop.f32.mrb[15].mxu1  ;;  %v3123_v22 = vadd.f32 %v2177_v41, %v2979_v6  ;;  %v1381_v23 = vmul.f32 0.5, %v3013_v63  ;;  %v1129_v29 = vmul.f32 0.70710677, %v3114_v16 }
  0xfb   :  { %1699 = vst.msk [vmem:[%s4407_s4 + $0x40] sm:$0xff] %vm90_vm0, %v1315_v0  ;;  %v1574_v12 = vadd.f32 1.0, %v2388_v7  ;;  %v2390_v15 = vpop.eup %2389  ;;  %v1318_v54 = vmul.f32 %v1254_v9, %v1062_v1  ;;  %v1064_v32 = vmul.f32 0.5, %v3027_v21  ;;  %v1449_v33 = vmul.f32 0.70710677, %v3118_v17 }
  0xfc   :  { %1961 = vst.msk [vmem:[%s4407_s4 + $0x50] sm:$0xff] %vm90_vm0, %v1635_v8  ;;  %v3120_v58 = vpop.f32.mrb[16].mxu0  ;;  %v2392_v18 = vpop.eup %2391  ;;  %v1253_v20 = vadd.f32 1.0, %v2390_v15  ;;  %v1132_v34 = vmul.f32 0.70710677, %v3123_v22  ;;  %2405 = verf.f32 %v1129_v29  ;;  %v3146_v63 = vadd.f32 %v3056_v46, %v2979_v6 }
  0xfd   :  { %v1638_v19 = vmul.f32 %v1574_v12, %v1382_v10  ;;  %v3125_v24 = vpop.f32.mrb[16].mxu1  ;;  %v3127_v25 = vpop.f32.mrb[17].mxu0  ;;  %1702 = vst.msk [vmem:[%s4407_s4 + $0x68] sm:$0xff] %vm90_vm0, %v1318_v54  ;;  %v1573_v28 = vadd.f32 1.0, %v2392_v18  ;;  %v3150_v39 = vadd.f32 %v2979_v6, %v3058_v47  ;;  %2407 = verf.f32 %v1449_v33 }
  0xfe   :  { %v3135_v30 = vpop.f32.mrb[17].mxu1  ;;  %v1317_v31 = vmul.f32 %v1253_v20, %v1061_v13  ;;  %v2394_v37 = vpop.eup %2393  ;;  %v3160_v43 = vadd.f32 %v2979_v6, %v3065_v51  ;;  %v3163_v44 = vadd.f32 %v2180_v61, %v2979_v6  ;;  %v1384_v47 = vmul.f32 0.5, %v3036_v26 }
  0xff   :  { %1964 = vst.msk [vmem:[%s4407_s4 + $0x78] sm:$0xff] %vm90_vm0, %v1638_v19  ;;  %v1637_v38 = vmul.f32 %v1573_v28, %v1381_v23  ;;  %v2396_v42 = vpop.eup %2395  ;;  %v1256_v21 = vadd.f32 1.0, %v2394_v37  ;;  %2409 = verf.f32 %v1132_v34  ;;  %v1452_v48 = vmul.f32 0.70710677, %v3146_v63 }
 0x100   :  { %v3152_v41 = vpop.f32.mrb[18].mxu0  ;;  %1701 = vst.msk [vmem:[%s4407_s4 + $0x60] sm:$0xff] %vm90_vm0, %v1317_v31  ;;  %v3165_v45 = vpop.f32.mrb[18].mxu1  ;;  %v1576_v36 = vadd.f32 1.0, %v2396_v42  ;;  %v1063_v51 = vmul.f32 0.5, %v3039_v27  ;;  %v1383_v57 = vmul.f32 0.5, %v3072_v56  ;;  %v3199_v8 = vadd.f32 %v3090_v4, %v2979_v6 }
 0x101   :  { %v3167_v35 = vpop.f32.mrb[19].mxu0  ;;  %v2398_v46 = vpop.eup %2397  ;;  %1963 = vst.msk [vmem:[%s4407_s4 + $0x70] sm:$0xff] %vm90_vm0, %v1637_v38  ;;  %v1320_v50 = vmul.f32 %v1256_v21, %v1064_v32  ;;  %v1131_v52 = vmul.f32 0.70710677, %v3150_v39  ;;  %2411 = verf.f32 %v1452_v48  ;;  %v1451_v59 = vmul.f32 0.70710677, %v3160_v43 }
 0x102   :  { %v3175_v49 = vpop.f32.mrb[19].mxu1  ;;  %v1255_v40 = vadd.f32 1.0, %v2398_v46  ;;  %v1640_v55 = vmul.f32 %v1576_v36, %v1384_v47  ;;  %v2400_v26 = vpop.eup %2399  ;;  %v1066_v27 = vmul.f32 0.5, %v3079_v60  ;;  %v1134_v0 = vmul.f32 0.70710677, %v3163_v44 }
 0x103   :  { %1704 = vst.msk [vmem:[%s4407_s4 + $0x88] sm:$0xff] %vm90_vm0, %v1320_v50  ;;  %2413 = verf.f32 %v1131_v52  ;;  %v2402_v2 = vpop.eup %2401  ;;  %v1575_v7 = vadd.f32 1.0, %v2400_v26  ;;  %v3203_v60 = vadd.f32 %v2979_v6, %v3092_v5  ;;  %v3213_v12 = vadd.f32 %v2979_v6, %v3100_v11 }
 0x104   :  { %v3181_v61 = vpop.f32.mrb[20].mxu0  ;;  %v1319_v62 = vmul.f32 %v1255_v40, %v1063_v51  ;;  %v3189_v1 = vpop.f32.mrb[20].mxu1  ;;  %1966 = vst.msk [vmem:[%s4407_s4 + $0x98] sm:$0xff] %vm90_vm0, %v1640_v55  ;;  %2415 = verf.f32 %v1451_v59  ;;  %v1258_v53 = vadd.f32 1.0, %v2402_v2  ;;  %v3217_v4 = vadd.f32 %v3120_v58, %v2979_v6 }
 0x105   :  { %v3191_v56 = vpop.f32.mrb[21].mxu0  ;;  %v3205_v9 = vpop.f32.mrb[21].mxu1  ;;  %2417 = verf.f32 %v1134_v0  ;;  %v1639_v5 = vmul.f32 %v1575_v7, %v1383_v57  ;;  %v1386_v13 = vmul.f32 0.5, %v3088_v3  ;;  %v1454_v15 = vmul.f32 0.70710677, %v3199_v8 }
 0x106   :  { %v2404_v10 = vpop.eup %2403  ;;  %1703 = vst.msk [vmem:[%s4407_s4 + $0x80] sm:$0xff] %vm90_vm0, %v1319_v62  ;;  %v1322_v18 = vmul.f32 %v1258_v53, %v1066_v27  ;;  %v1065_v19 = vmul.f32 0.5, %v3114_v16  ;;  %v1385_v20 = vmul.f32 0.5, %v3118_v17  ;;  %v1133_v11 = vmul.f32 0.70710677, %v3203_v60 }
 0x107   :  { %v1578_v14 = vadd.f32 1.0, %v2404_v10  ;;  %v2406_v58 = vpop.eup %2405  ;;  %1965 = vst.msk [vmem:[%s4407_s4 + $0x90] sm:$0xff] %vm90_vm0, %v1639_v5  ;;  %v1068_v29 = vmul.f32 0.5, %v3123_v22  ;;  %2419 = verf.f32 %v1454_v15  ;;  %v1453_v16 = vmul.f32 0.70710677, %v3213_v12 }
 0x108   :  { %v3221_v54 = vpop.f32.mrb[22].mxu0  ;;  %v3226_v23 = vpop.f32.mrb[22].mxu1  ;;  %1706 = vst.msk [vmem:[%s4407_s4 + $0xa8] sm:$0xff] %vm90_vm0, %v1322_v18  ;;  %v1257_v32 = vadd.f32 1.0, %v2406_v58  ;;  %2421 = verf.f32 %v1133_v11  ;;  %v1136_v33 = vmul.f32 0.70710677, %v3217_v4  ;;  %v3245_v34 = vadd.f32 %v3125_v24, %v2979_v6 }
 0x109   :  { %v3228_v28 = vpop.f32.mrb[23].mxu0  ;;  %v1642_v3 = vmul.f32 %v1578_v14, %v1386_v13  ;;  %v3236_v31 = vpop.f32.mrb[23].mxu1  ;;  %2423 = verf.f32 %v1453_v16  ;;  %v3253_v38 = vadd.f32 %v2979_v6, %v3127_v25  ;;  %v3257_v42 = vadd.f32 %v2979_v6, %v3135_v30 }
 0x10a   :  { %v2408_v17 = vpop.eup %2407  ;;  %v1321_v24 = vmul.f32 %v1257_v32, %v1065_v19  ;;  %v1388_v47 = vmul.f32 0.5, %v3146_v63  ;;  %2425 = verf.f32 %v1136_v33  ;;  %v1067_v25 = vmul.f32 0.5, %v3150_v39 }
 0x10b   :  { %v2410_v22 = vpop.eup %2409  ;;  %1968 = vst.msk [vmem:[%s4407_s4 + $0xb8] sm:$0xff] %vm90_vm0, %v1642_v3  ;;  %v1577_v37 = vadd.f32 1.0, %v2408_v17  ;;  %v1456_v40 = vmul.f32 0.70710677, %v3245_v34  ;;  %v1135_v30 = vmul.f32 0.70710677, %v3253_v38  ;;  %v3283_v27 = vadd.f32 %v3152_v41, %v2979_v6 }
 0x10c   :  { %v3259_v21 = vpop.f32.mrb[24].mxu0  ;;  %v1260_v46 = vadd.f32 1.0, %v2410_v22  ;;  %v3262_v36 = vpop.f32.mrb[24].mxu1  ;;  %1705 = vst.msk [vmem:[%s4407_s4 + $0xa0] sm:$0xff] %vm90_vm0, %v1321_v24  ;;  %v1387_v59 = vmul.f32 0.5, %v3160_v43  ;;  %v3287_v0 = vadd.f32 %v3165_v45, %v2979_v6  ;;  %v3297_v53 = vadd.f32 %v2979_v6, %v3167_v35 }
 0x10d   :  { %v3264_v48 = vpop.f32.mrb[25].mxu0  ;;  %v2412_v50 = vpop.eup %2411  ;;  %v1641_v51 = vmul.f32 %v1577_v37, %v1385_v20  ;;  %v1455_v26 = vmul.f32 0.70710677, %v3257_v42  ;;  %2427 = verf.f32 %v1456_v40  ;;  %v1070_v13 = vmul.f32 0.5, %v3163_v44 }
 0x10e   :  { %v3269_v52 = vpop.f32.mrb[25].mxu1  ;;  %v2414_v55 = vpop.eup %2413  ;;  %v1324_v63 = vmul.f32 %v1260_v46, %v1068_v29  ;;  %v1580_v57 = vadd.f32 1.0, %v2412_v50  ;;  %2429 = verf.f32 %v1135_v30  ;;  %v1390_v35 = vmul.f32 0.5, %v3199_v8 }
 0x10f   :  { %v2416_v62 = vpop.eup %2415  ;;  %1967 = vst.msk [vmem:[%s4407_s4 + $0xb0] sm:$0xff] %vm90_vm0, %v1641_v51  ;;  %v1259_v39 = vadd.f32 1.0, %v2414_v55  ;;  %2431 = verf.f32 %v1455_v26  ;;  %v1138_v19 = vmul.f32 0.70710677, %v3283_v27  ;;  %v1458_v20 = vmul.f32 0.70710677, %v3287_v0 }
 0x110   :  { %v3289_v2 = vpop.f32.mrb[26].mxu0  ;;  %v2418_v43 = vpop.eup %2417  ;;  %1708 = vst.msk [vmem:[%s4407_s4 + $0xc8] sm:$0xff] %vm90_vm0, %v1324_v63  ;;  %v1644_v7 = vmul.f32 %v1580_v57, %v1388_v47  ;;  %v1579_v10 = vadd.f32 1.0, %v2416_v62  ;;  %v1069_v58 = vmul.f32 0.5, %v3203_v60  ;;  %v1137_v3 = vmul.f32 0.70710677, %v3297_v53 }
 0x111   :  { %v3299_v41 = vpop.f32.mrb[26].mxu1  ;;  %v3301_v5 = vpop.f32.mrb[27].mxu0  ;;  %v1323_v45 = vmul.f32 %v1259_v39, %v1067_v25  ;;  %v1262_v14 = vadd.f32 1.0, %v2418_v43  ;;  %v3321_v29 = vadd.f32 %v2979_v6, %v3175_v49  ;;  %2433 = verf.f32 %v1138_v19 }
 0x112   :  { %v3304_v15 = vpop.f32.mrb[27].mxu1  ;;  %1970 = vst.msk [vmem:[%s4407_s4 + $0xd8] sm:$0xff] %vm90_vm0, %v1644_v7  ;;  %v1643_v18 = vmul.f32 %v1579_v10, %v1387_v59  ;;  %v2420_v11 = vpop.eup %2419  ;;  %v3331_v32 = vadd.f32 %v3181_v61, %v2979_v6  ;;  %v3335_v60 = vadd.f32 %v3189_v1, %v2979_v6  ;;  %v1389_v24 = vmul.f32 0.5, %v3213_v12 }
 0x113   :  { %1707 = vst.msk [vmem:[%s4407_s4 + $0xc0] sm:$0xff] %vm90_vm0, %v1323_v45  ;;  %v1326_v44 = vmul.f32 %v1262_v14, %v1070_v13  ;;  %v2422_v16 = vpop.eup %2421  ;;  %v1582_v17 = vadd.f32 1.0, %v2420_v11  ;;  %2435 = verf.f32 %v1458_v20  ;;  %v1457_v61 = vmul.f32 0.70710677, %v3321_v29 }
 0x114   :  { %v3323_v8 = vpop.f32.mrb[28].mxu0  ;;  %1969 = vst.msk [vmem:[%s4407_s4 + $0xd0] sm:$0xff] %vm90_vm0, %v1643_v18  ;;  %v3337_v49 = vpop.f32.mrb[28].mxu1  ;;  %v1261_v37 = vadd.f32 1.0, %v2422_v16  ;;  %v1072_v51 = vmul.f32 0.5, %v3217_v4  ;;  %2437 = verf.f32 %v1137_v3  ;;  %v1392_v63 = vmul.f32 0.5, %v3245_v34 }
 0x115   :  { %v3339_v33 = vpop.f32.mrb[29].mxu0  ;;  %v2424_v22 = vpop.eup %2423  ;;  %1710 = vst.msk [vmem:[%s4407_s4 + $0xe8] sm:$0xff] %vm90_vm0, %v1326_v44  ;;  %v1646_v47 = vmul.f32 %v1582_v17, %v1390_v35  ;;  %2439 = verf.f32 %v1457_v61  ;;  %v1140_v30 = vmul.f32 0.70710677, %v3331_v32  ;;  %v1460_v57 = vmul.f32 0.70710677, %v3335_v60 }
 0x116   :  { %v3347_v46 = vpop.f32.mrb[29].mxu1  ;;  %v2426_v1 = vpop.eup %2425  ;;  %v1581_v50 = vadd.f32 1.0, %v2424_v22  ;;  %v1325_v25 = vmul.f32 %v1261_v37, %v1069_v58  ;;  %v3361_v4 = vadd.f32 %v2979_v6, %v3191_v56  ;;  %v3373_v34 = vadd.f32 %v2979_v6, %v3205_v9 }
 0x117   :  { %v1264_v40 = vadd.f32 1.0, %v2426_v1  ;;  %1972 = vst.msk [vmem:[%s4407_s4 + $0xf8] sm:$0xff] %vm90_vm0, %v1646_v47  ;;  %v2428_v62 = vpop.eup %2427  ;;  %2441 = verf.f32 %v1140_v30  ;;  %v3377_v56 = vadd.f32 %v3221_v54, %v2979_v6  ;;  %v1071_v45 = vmul.f32 0.5, %v3253_v38 }
 0x118   :  { %v3351_v55 = vpop.f32.mrb[30].mxu0  ;;  %v1645_v12 = vmul.f32 %v1581_v50, %v1389_v24  ;;  %v3363_v59 = vpop.f32.mrb[30].mxu1  ;;  %1709 = vst.msk [vmem:[%s4407_s4 + $0xe0] sm:$0xff] %vm90_vm0, %v1325_v25  ;;  %v1584_v10 = vadd.f32 1.0, %v2428_v62  ;;  %2443 = verf.f32 %v1460_v57  ;;  %v1139_v13 = vmul.f32 0.70710677, %v3361_v4 }
 0x119   :  { %v3365_v26 = vpop.f32.mrb[31].mxu0  ;;  %v1328_v39 = vmul.f32 %v1264_v40, %v1072_v51  ;;  %v3379_v43 = vpop.f32.mrb[31].mxu1  ;;  %v1391_v14 = vmul.f32 0.5, %v3257_v42  ;;  %v1074_v18 = vmul.f32 0.5, %v3283_v27  ;;  %v1459_v35 = vmul.f32 0.70710677, %v3373_v34 }
 0x11a   :  { %v2430_v7 = vpop.eup %2429  ;;  %1971 = vst.msk [vmem:[%s4407_s4 + $0xf0] sm:$0xff] %vm90_vm0, %v1645_v12  ;;  %v1648_v20 = vmul.f32 %v1584_v10, %v1392_v63  ;;  %2445 = verf.f32 %v1139_v13  ;;  %v1142_v11 = vmul.f32 0.70710677, %v3377_v56  ;;  %v3403_v42 = vadd.f32 %v3226_v23, %v2979_v6 }
 0x11b   :  { %v2432_v9 = vpop.eup %2431  ;;  %1712 = vst.msk [vmem:[%s4407_s4 + $0x108] sm:$0xff] %vm90_vm0, %v1328_v39  ;;  %v1263_v54 = vadd.f32 1.0, %v2430_v7  ;;  %2447 = verf.f32 %v1459_v35  ;;  %v3407_v27 = vadd.f32 %v2979_v6, %v3228_v28  ;;  %v3417_v37 = vadd.f32 %v2979_v6, %v3236_v31 }
 0x11c   :  { %v3394_v19 = vpop.f32.mrb[32].mxu0  ;;  %v1583_v38 = vadd.f32 1.0, %v2432_v9  ;;  %v3397_v44 = vpop.f32.mrb[32].mxu1  ;;  %1974 = vst.msk [vmem:[%s4407_s4 + $0x118] sm:$0xff] %vm90_vm0, %v1648_v20  ;;  %2449 = verf.f32 %v1142_v11  ;;  %v3421_v23 = vadd.f32 %v3259_v21, %v2979_v6  ;;  %v1394_v61 = vmul.f32 0.5, %v3287_v0 }
 0x11d   :  { %v3399_v58 = vpop.f32.mrb[33].mxu0  ;;  %v1327_v3 = vmul.f32 %v1263_v54, %v1071_v45  ;;  %v3409_v16 = vpop.f32.mrb[33].mxu1  ;;  %v1073_v1 = vmul.f32 0.5, %v3297_v53  ;;  %v1462_v47 = vmul.f32 0.70710677, %v3403_v42  ;;  %v1393_v51 = vmul.f32 0.5, %v3321_v29 }
 0x11e   :  { %v2434_v17 = vpop.eup %2433  ;;  %v1647_v22 = vmul.f32 %v1583_v38, %v1391_v14  ;;  %v1141_v25 = vmul.f32 0.70710677, %v3407_v27  ;;  %v1461_v40 = vmul.f32 0.70710677, %v3417_v37  ;;  %v1076_v12 = vmul.f32 0.5, %v3331_v32 }
 0x11f   :  { %v2436_v28 = vpop.eup %2435  ;;  %1711 = vst.msk [vmem:[%s4407_s4 + $0x100] sm:$0xff] %vm90_vm0, %v1327_v3  ;;  %v1266_v24 = vadd.f32 1.0, %v2434_v17  ;;  %2451 = verf.f32 %v1462_v47  ;;  %v1144_v7 = vmul.f32 0.70710677, %v3421_v23  ;;  %v3453_v32 = vadd.f32 %v3262_v36, %v2979_v6 }
 0x120   :  { %v3430_v50 = vpop.f32.mrb[34].mxu0  ;;  %v2438_v31 = vpop.eup %2437  ;;  %1973 = vst.msk [vmem:[%s4407_s4 + $0x110] sm:$0xff] %vm90_vm0, %v1647_v22  ;;  %v1586_v21 = vadd.f32 1.0, %v2436_v28  ;;  %2453 = verf.f32 %v1141_v25  ;;  %v3457_v13 = vadd.f32 %v2979_v6, %v3264_v48  ;;  %v3467_v35 = vadd.f32 %v2979_v6, %v3269_v52 }
 0x121   :  { %v2440_v0 = vpop.eup %2439  ;;  %v1330_v30 = vmul.f32 %v1266_v24, %v1074_v18  ;;  %v1265_v53 = vadd.f32 1.0, %v2438_v31  ;;  %v3440_v63 = vpop.f32.mrb[34].mxu1  ;;  %2455 = verf.f32 %v1461_v40  ;;  %v1396_v48 = vmul.f32 0.5, %v3335_v60 }
 0x122   :  { %v3442_v57 = vpop.f32.mrb[35].mxu0  ;;  %v1650_v62 = vmul.f32 %v1586_v21, %v1394_v61  ;;  %v1585_v39 = vadd.f32 1.0, %v2440_v0  ;;  %v3445_v29 = vpop.f32.mrb[35].mxu1  ;;  %2457 = verf.f32 %v1144_v7  ;;  %v1075_v11 = vmul.f32 0.5, %v3361_v4 }
 0x123   :  { %v2442_v10 = vpop.eup %2441  ;;  %1714 = vst.msk [vmem:[%s4407_s4 + $0x128] sm:$0xff] %vm90_vm0, %v1330_v30  ;;  %v1329_v45 = vmul.f32 %v1265_v53, %v1073_v1  ;;  %v1464_v3 = vmul.f32 0.70710677, %v3453_v32  ;;  %v1395_v28 = vmul.f32 0.5, %v3373_v34  ;;  %v1143_v24 = vmul.f32 0.70710677, %v3457_v13 }
 0x124   :  { %v3459_v9 = vpop.f32.mrb[36].mxu0  ;;  %v2444_v54 = vpop.eup %2443  ;;  %1976 = vst.msk [vmem:[%s4407_s4 + $0x138] sm:$0xff] %vm90_vm0, %v1650_v62  ;;  %v1649_v14 = vmul.f32 %v1585_v39, %v1393_v51  ;;  %v1268_v18 = vadd.f32 1.0, %v2442_v10  ;;  %v1463_v60 = vmul.f32 0.70710677, %v3467_v35  ;;  %v3491_v47 = vadd.f32 %v3289_v2, %v2979_v6 }
 0x125   :  { %v3469_v36 = vpop.f32.mrb[36].mxu1  ;;  %v3471_v20 = vpop.f32.mrb[37].mxu0  ;;  %1713 = vst.msk [vmem:[%s4407_s4 + $0x120] sm:$0xff] %vm90_vm0, %v1329_v45  ;;  %v1588_v38 = vadd.f32 1.0, %v2444_v54  ;;  %2459 = verf.f32 %v1464_v3  ;;  %v3501_v51 = vadd.f32 %v3299_v41, %v2979_v6  ;;  %v3505_v25 = vadd.f32 %v2979_v6, %v3301_v5 }
 0x126   :  { %v3480_v17 = vpop.f32.mrb[37].mxu1  ;;  %v2446_v52 = vpop.eup %2445  ;;  %1975 = vst.msk [vmem:[%s4407_s4 + $0x130] sm:$0xff] %vm90_vm0, %v1649_v14  ;;  %v1332_v22 = vmul.f32 %v1268_v18, %v1076_v12  ;;  %2461 = verf.f32 %v1143_v24  ;;  %v1078_v30 = vmul.f32 0.5, %v3377_v56  ;;  %v1398_v5 = vmul.f32 0.5, %v3403_v42 }
 0x127   :  { %v2448_v61 = vpop.eup %2447  ;;  %v1652_v1 = vmul.f32 %v1588_v38, %v1396_v48  ;;  %v1267_v4 = vadd.f32 1.0, %v2446_v52  ;;  %2463 = verf.f32 %v1463_v60  ;;  %v1146_v62 = vmul.f32 0.70710677, %v3491_v47 }
 0x128   :  { %v3493_v31 = vpop.f32.mrb[38].mxu0  ;;  %v2450_v21 = vpop.eup %2449  ;;  %1716 = vst.msk [vmem:[%s4407_s4 + $0x148] sm:$0xff] %vm90_vm0, %v1332_v22  ;;  %v1587_v34 = vadd.f32 1.0, %v2448_v61  ;;  %v1466_v39 = vmul.f32 0.70710677, %v3501_v51  ;;  %v1077_v56 = vmul.f32 0.5, %v3407_v27  ;;  %v3529_v54 = vadd.f32 %v2979_v6, %v3304_v15 }
 0x129   :  { %v3507_v2 = vpop.f32.mrb[38].mxu1  ;;  %v3509_v40 = vpop.f32.mrb[39].mxu0  ;;  %1978 = vst.msk [vmem:[%s4407_s4 + $0x158] sm:$0xff] %vm90_vm0, %v1652_v1  ;;  %v1331_v0 = vmul.f32 %v1267_v4, %v1075_v11  ;;  %v1270_v53 = vadd.f32 1.0, %v2450_v21  ;;  %v1145_v45 = vmul.f32 0.70710677, %v3505_v25  ;;  %2465 = verf.f32 %v1146_v62 }
 0x12a   :  { %v3516_v41 = vpop.f32.mrb[39].mxu1  ;;  %v1651_v12 = vmul.f32 %v1587_v34, %v1395_v28  ;;  %v2452_v7 = vpop.eup %2451  ;;  %v3539_v48 = vadd.f32 %v3323_v8, %v2979_v6  ;;  %v3543_v27 = vadd.f32 %v3337_v49, %v2979_v6  ;;  %v1397_v52 = vmul.f32 0.5, %v3417_v37 }
 0x12b   :  { %1715 = vst.msk [vmem:[%s4407_s4 + $0x140] sm:$0xff] %vm90_vm0, %v1331_v0  ;;  %v1334_v10 = vmul.f32 %v1270_v53, %v1078_v30  ;;  %v2454_v14 = vpop.eup %2453  ;;  %v1590_v18 = vadd.f32 1.0, %v2452_v7  ;;  %2467 = verf.f32 %v1466_v39  ;;  %v1465_v8 = vmul.f32 0.70710677, %v3529_v54 }
 0x12c   :  { %v3531_v42 = vpop.f32.mrb[40].mxu0  ;;  %1977 = vst.msk [vmem:[%s4407_s4 + $0x150] sm:$0xff] %vm90_vm0, %v1651_v12  ;;  %v3545_v15 = vpop.f32.mrb[40].mxu1  ;;  %v1269_v3 = vadd.f32 1.0, %v2454_v14  ;;  %v1080_v60 = vmul.f32 0.5, %v3421_v23  ;;  %2469 = verf.f32 %v1145_v45  ;;  %v1400_v34 = vmul.f32 0.5, %v3453_v32 }
 0x12d   :  { %v3547_v38 = vpop.f32.mrb[41].mxu0  ;;  %v2456_v11 = vpop.eup %2455  ;;  %1718 = vst.msk [vmem:[%s4407_s4 + $0x168] sm:$0xff] %vm90_vm0, %v1334_v10  ;;  %v1654_v28 = vmul.f32 %v1590_v18, %v1398_v5  ;;  %2471 = verf.f32 %v1465_v8  ;;  %v1148_v4 = vmul.f32 0.70710677, %v3539_v48  ;;  %v1468_v0 = vmul.f32 0.70710677, %v3543_v27 }
 0x12e   :  { %v3555_v22 = vpop.f32.mrb[41].mxu1  ;;  %v2458_v49 = vpop.eup %2457  ;;  %v1589_v24 = vadd.f32 1.0, %v2456_v11  ;;  %v1333_v61 = vmul.f32 %v1269_v3, %v1077_v56  ;;  %v3569_v23 = vadd.f32 %v2979_v6, %v3339_v33  ;;  %v3581_v32 = vadd.f32 %v2979_v6, %v3347_v46 }
 0x12f   :  { %v1272_v1 = vadd.f32 1.0, %v2458_v49  ;;  %1980 = vst.msk [vmem:[%s4407_s4 + $0x178] sm:$0xff] %vm90_vm0, %v1654_v28  ;;  %v2460_v12 = vpop.eup %2459  ;;  %2473 = verf.f32 %v1148_v4  ;;  %v3585_v33 = vadd.f32 %v3351_v55, %v2979_v6  ;;  %v1079_v10 = vmul.f32 0.5, %v3457_v13 }
 0x130   :  { %v3559_v21 = vpop.f32.mrb[42].mxu0  ;;  %v1653_v37 = vmul.f32 %v1589_v24, %v1397_v52  ;;  %v3571_v30 = vpop.f32.mrb[42].mxu1  ;;  %1717 = vst.msk [vmem:[%s4407_s4 + $0x160] sm:$0xff] %vm90_vm0, %v1333_v61  ;;  %v1592_v7 = vadd.f32 1.0, %v2460_v12  ;;  %2475 = verf.f32 %v1468_v0  ;;  %v1147_v56 = vmul.f32 0.70710677, %v3569_v23 }
 0x131   :  { %v3573_v53 = vpop.f32.mrb[43].mxu0  ;;  %v1336_v5 = vmul.f32 %v1272_v1, %v1080_v60  ;;  %v3587_v62 = vpop.f32.mrb[43].mxu1  ;;  %v1399_v55 = vmul.f32 0.5, %v3467_v35  ;;  %v1082_v45 = vmul.f32 0.5, %v3491_v47  ;;  %v1467_v14 = vmul.f32 0.70710677, %v3581_v32 }
 0x132   :  { %v2462_v39 = vpop.eup %2461  ;;  %1979 = vst.msk [vmem:[%s4407_s4 + $0x170] sm:$0xff] %vm90_vm0, %v1653_v37  ;;  %v1656_v11 = vmul.f32 %v1592_v7, %v1400_v34  ;;  %2477 = verf.f32 %v1147_v56  ;;  %v1150_v3 = vmul.f32 0.70710677, %v3585_v33  ;;  %v3612_v35 = vld [vmem:[%s4406_s3] ss:$0 sm:$0xff]  ;;  %v1402_v37 = vmul.f32 0.5, %v3501_v51 }
 0x133   :  { %v2464_v46 = vpop.eup %2463  ;;  %1720 = vst.msk [vmem:[%s4407_s4 + $0x188] sm:$0xff] %vm90_vm0, %v1336_v5  ;;  %v1271_v6 = vadd.f32 1.0, %v2462_v39  ;;  %2479 = verf.f32 %v1467_v14  ;;  %v3616_v47 = vadd.f32 %v3612_v35, %v3363_v59  ;;  %v3620_v28 = vadd.f32 %v3612_v35, %v3365_v26 }
 0x134   :  { %v3602_v18 = vpop.f32.mrb[44].mxu0  ;;  %v1591_v13 = vadd.f32 1.0, %v2464_v46  ;;  %v3605_v52 = vpop.f32.mrb[44].mxu1  ;;  %1982 = vst.msk [vmem:[%s4407_s4 + $0x198] sm:$0xff] %vm90_vm0, %v1656_v11  ;;  %2481 = verf.f32 %v1150_v3  ;;  %v3630_v1 = vadd.f32 %v3612_v35, %v3379_v43  ;;  %v3634_v59 = vadd.f32 %v3612_v35, %v3394_v19 }
 0x135   :  { %v3607_v8 = vpop.f32.mrb[45].mxu0  ;;  %v1335_v49 = vmul.f32 %v1271_v6, %v1079_v10  ;;  %v3622_v24 = vpop.f32.mrb[45].mxu1  ;;  %v1081_v34 = vmul.f32 0.5, %v3505_v25  ;;  %v1470_v0 = vmul.f32 0.70710677, %v3616_v47  ;;  %v1401_v5 = vmul.f32 0.5, %v3529_v54 }
 0x136   :  { %v2466_v60 = vpop.eup %2465  ;;  %v1655_v61 = vmul.f32 %v1591_v13, %v1399_v55  ;;  %v1149_v39 = vmul.f32 0.70710677, %v3620_v28  ;;  %v1469_v7 = vmul.f32 0.70710677, %v3630_v1  ;;  %v1084_v56 = vmul.f32 0.5, %v3539_v48 }
 0x137   :  { %v2468_v26 = vpop.eup %2467  ;;  %1719 = vst.msk [vmem:[%s4407_s4 + $0x180] sm:$0xff] %vm90_vm0, %v1335_v49  ;;  %v1274_v4 = vadd.f32 1.0, %v2466_v60  ;;  %2483 = verf.f32 %v1470_v0  ;;  %v1152_v11 = vmul.f32 0.70710677, %v3634_v59  ;;  %v3666_v48 = vadd.f32 %v3612_v35, %v3397_v44 }
 0x138   :  { %v3643_v12 = vpop.f32.mrb[46].mxu0  ;;  %v2470_v43 = vpop.eup %2469  ;;  %1981 = vst.msk [vmem:[%s4407_s4 + $0x190] sm:$0xff] %vm90_vm0, %v1655_v61  ;;  %v1594_v19 = vadd.f32 1.0, %v2468_v26  ;;  %2485 = verf.f32 %v1149_v39  ;;  %v3670_v3 = vadd.f32 %v3612_v35, %v3399_v58  ;;  %v1404_v58 = vmul.f32 0.5, %v3543_v27 }
 0x139   :  { %v2472_v51 = vpop.eup %2471  ;;  %v1338_v10 = vmul.f32 %v1274_v4, %v1082_v45  ;;  %v1273_v25 = vadd.f32 1.0, %v2470_v43  ;;  %v3653_v46 = vpop.f32.mrb[46].mxu1  ;;  %2487 = verf.f32 %v1469_v7  ;;  %v3680_v4 = vadd.f32 %v3612_v35, %v3409_v16 }
 0x13a   :  { %v3655_v6 = vpop.f32.mrb[47].mxu0  ;;  %v1658_v55 = vmul.f32 %v1594_v19, %v1402_v37  ;;  %v1593_v14 = vadd.f32 1.0, %v2472_v51  ;;  %v3658_v54 = vpop.f32.mrb[47].mxu1  ;;  %2489 = verf.f32 %v1152_v11  ;;  %v1083_v0 = vmul.f32 0.5, %v3569_v23 }
 0x13b   :  { %v2474_v13 = vpop.eup %2473  ;;  %1722 = vst.msk [vmem:[%s4407_s4 + $0x1a8] sm:$0xff] %vm90_vm0, %v1338_v10  ;;  %v1337_v45 = vmul.f32 %v1273_v25, %v1081_v34  ;;  %v1472_v43 = vmul.f32 0.70710677, %v3666_v48  ;;  %v1403_v39 = vmul.f32 0.5, %v3581_v32  ;;  %v1151_v7 = vmul.f32 0.70710677, %v3670_v3 }
 0x13c   :  { %v3672_v49 = vpop.f32.mrb[48].mxu0  ;;  %v2476_v60 = vpop.eup %2475  ;;  %1984 = vst.msk [vmem:[%s4407_s4 + $0x1b8] sm:$0xff] %vm90_vm0, %v1658_v55  ;;  %v1657_v61 = vmul.f32 %v1593_v14, %v1401_v5  ;;  %v1276_v26 = vadd.f32 1.0, %v2474_v13  ;;  %v1471_v27 = vmul.f32 0.70710677, %v3680_v4  ;;  %v3704_v25 = vadd.f32 %v3612_v35, %v3430_v50 }
 0x13d   :  { %v3682_v44 = vpop.f32.mrb[48].mxu1  ;;  %v3684_v37 = vpop.f32.mrb[49].mxu0  ;;  %1721 = vst.msk [vmem:[%s4407_s4 + $0x1a0] sm:$0xff] %vm90_vm0, %v1337_v45  ;;  %v1596_v34 = vadd.f32 1.0, %v2476_v60  ;;  %2491 = verf.f32 %v1472_v43  ;;  %v3718_v11 = vadd.f32 %v3612_v35, %v3442_v57  ;;  %v1086_v60 = vmul.f32 0.5, %v3585_v33 }
 0x13e   :  { %v3693_v19 = vpop.f32.mrb[49].mxu1  ;;  %v2478_v16 = vpop.eup %2477  ;;  %1983 = vst.msk [vmem:[%s4407_s4 + $0x1b0] sm:$0xff] %vm90_vm0, %v1657_v61  ;;  %v1340_v5 = vmul.f32 %v1276_v26, %v1084_v56  ;;  %2493 = verf.f32 %v1151_v7  ;;  %v3714_v56 = vadd.f32 %v3612_v35, %v3440_v63  ;;  %v1406_v57 = vmul.f32 0.5, %v3616_v47 }
 0x13f   :  { %v2480_v51 = vpop.eup %2479  ;;  %v1660_v10 = vmul.f32 %v1596_v34, %v1404_v58  ;;  %v1275_v23 = vadd.f32 1.0, %v2478_v16  ;;  %2495 = verf.f32 %v1471_v27  ;;  %v1154_v58 = vmul.f32 0.70710677, %v3704_v25 }
 0x140   :  { %v3706_v55 = vpop.f32.mrb[50].mxu0  ;;  %v2482_v14 = vpop.eup %2481  ;;  %1724 = vst.msk [vmem:[%s4407_s4 + $0x1c8] sm:$0xff] %vm90_vm0, %v1340_v5  ;;  %v1595_v32 = vadd.f32 1.0, %v2480_v51  ;;  %v1474_v34 = vmul.f32 0.70710677, %v3714_v56  ;;  %v1085_v33 = vmul.f32 0.5, %v3620_v28  ;;  %v3742_v5 = vadd.f32 %v3612_v35, %v3445_v29 }
 0x141   :  { %v3720_v50 = vpop.f32.mrb[50].mxu1  ;;  %v3722_v13 = vpop.f32.mrb[51].mxu0  ;;  %1986 = vst.msk [vmem:[%s4407_s4 + $0x1d8] sm:$0xff] %vm90_vm0, %v1660_v10  ;;  %v1339_v45 = vmul.f32 %v1275_v23, %v1083_v0  ;;  %v1278_v61 = vadd.f32 1.0, %v2482_v14  ;;  %v1153_v16 = vmul.f32 0.70710677, %v3718_v11  ;;  %2497 = verf.f32 %v1154_v58 }
 0x142   :  { %v3729_v63 = vpop.f32.mrb[51].mxu1  ;;  %v1659_v26 = vmul.f32 %v1595_v32, %v1403_v39  ;;  %v2484_v43 = vpop.eup %2483  ;;  %v3752_v27 = vadd.f32 %v3612_v35, %v3459_v9  ;;  %v3756_v28 = vadd.f32 %v3612_v35, %v3469_v36  ;;  %v1405_v14 = vmul.f32 0.5, %v3630_v1 }
 0x143   :  { %1723 = vst.msk [vmem:[%s4407_s4 + $0x1c0] sm:$0xff] %vm90_vm0, %v1339_v45  ;;  %v1342_v0 = vmul.f32 %v1278_v61, %v1086_v60  ;;  %v2486_v39 = vpop.eup %2485  ;;  %v1598_v7 = vadd.f32 1.0, %v2484_v43  ;;  %2499 = verf.f32 %v1474_v34  ;;  %v1473_v9 = vmul.f32 0.70710677, %v3742_v5 }
 0x144   :  { %v3744_v47 = vpop.f32.mrb[52].mxu0  ;;  %1985 = vst.msk [vmem:[%s4407_s4 + $0x1d0] sm:$0xff] %vm90_vm0, %v1659_v26  ;;  %v3758_v29 = vpop.f32.mrb[52].mxu1  ;;  %v1277_v23 = vadd.f32 1.0, %v2486_v39  ;;  %v1088_v61 = vmul.f32 0.5, %v3634_v59  ;;  %2501 = verf.f32 %v1153_v16  ;;  %v1408_v34 = vmul.f32 0.5, %v3666_v48 }
 0x145   :  { %v3760_v51 = vpop.f32.mrb[53].mxu0  ;;  %v2488_v10 = vpop.eup %2487  ;;  %1726 = vst.msk [vmem:[%s4407_s4 + $0x1e8] sm:$0xff] %vm90_vm0, %v1342_v0  ;;  %v1662_v45 = vmul.f32 %v1598_v7, %v1406_v57  ;;  %2503 = verf.f32 %v1473_v9  ;;  %v1156_v43 = vmul.f32 0.70710677, %v3752_v27  ;;  %v1476_v57 = vmul.f32 0.70710677, %v3756_v28 }
 0x146   :  { %v3768_v32 = vpop.f32.mrb[53].mxu1  ;;  %v2490_v36 = vpop.eup %2489  ;;  %v1597_v60 = vadd.f32 1.0, %v2488_v10  ;;  %v1341_v26 = vmul.f32 %v1277_v23, %v1085_v33  ;;  %v3782_v59 = vadd.f32 %v3612_v35, %v3471_v20  ;;  %v3794_v48 = vadd.f32 %v3612_v35, %v3480_v17 }
 0x147   :  { %v1280_v58 = vadd.f32 1.0, %v2490_v36  ;;  %1988 = vst.msk [vmem:[%s4407_s4 + $0x1f8] sm:$0xff] %vm90_vm0, %v1662_v45  ;;  %v2492_v39 = vpop.eup %2491  ;;  %2505 = verf.f32 %v1156_v43  ;;  %v3798_v20 = vadd.f32 %v3612_v35, %v3493_v31  ;;  %v1087_v9 = vmul.f32 0.5, %v3670_v3 }
 0x148   :  { %v3772_v0 = vpop.f32.mrb[54].mxu0  ;;  %v1661_v1 = vmul.f32 %v1597_v60, %v1405_v14  ;;  %v3784_v33 = vpop.f32.mrb[54].mxu1  ;;  %1725 = vst.msk [vmem:[%s4407_s4 + $0x1e0] sm:$0xff] %vm90_vm0, %v1341_v26  ;;  %v1600_v14 = vadd.f32 1.0, %v2492_v39  ;;  %2507 = verf.f32 %v1476_v57  ;;  %v1155_v36 = vmul.f32 0.70710677, %v3782_v59 }
 0x149   :  { %v3786_v16 = vpop.f32.mrb[55].mxu0  ;;  %v1344_v7 = vmul.f32 %v1280_v58, %v1088_v61  ;;  %v3800_v10 = vpop.f32.mrb[55].mxu1  ;;  %v1407_v45 = vmul.f32 0.5, %v3680_v4  ;;  %v1090_v60 = vmul.f32 0.5, %v3704_v25  ;;  %v1475_v61 = vmul.f32 0.70710677, %v3794_v48 }
 0x14a   :  { %v2494_v23 = vpop.eup %2493  ;;  %1987 = vst.msk [vmem:[%s4407_s4 + $0x1f0] sm:$0xff] %vm90_vm0, %v1661_v1  ;;  %v1664_v58 = vmul.f32 %v1600_v14, %v1408_v34  ;;  %2509 = verf.f32 %v1155_v36  ;;  %v1158_v43 = vmul.f32 0.70710677, %v3798_v20  ;;  %v3824_v4 = vadd.f32 %v3612_v35, %v3507_v2 }
 0x14b   :  { %v2496_v17 = vpop.eup %2495  ;;  %1728 = vst.msk [vmem:[%s4407_s4 + $0x208] sm:$0xff] %vm90_vm0, %v1344_v7  ;;  %v1279_v31 = vadd.f32 1.0, %v2494_v23  ;;  %2511 = verf.f32 %v1475_v61  ;;  %v3828_v25 = vadd.f32 %v3612_v35, %v3509_v40  ;;  %v3838_v14 = vadd.f32 %v3612_v35, %v3516_v41 }
 0x14c   :  { %v3815_v26 = vpop.f32.mrb[56].mxu0  ;;  %v1599_v3 = vadd.f32 1.0, %v2496_v17  ;;  %v3818_v1 = vpop.f32.mrb[56].mxu1  ;;  %1990 = vst.msk [vmem:[%s4407_s4 + $0x218] sm:$0xff] %vm90_vm0, %v1664_v58  ;;  %2513 = verf.f32 %v1158_v43  ;;  %v3842_v2 = vadd.f32 %v3612_v35, %v3531_v42  ;;  %v1410_v36 = vmul.f32 0.5, %v3714_v56 }
 0x14d   :  { %v3820_v57 = vpop.f32.mrb[57].mxu0  ;;  %v1343_v39 = vmul.f32 %v1279_v31, %v1087_v9  ;;  %v3830_v7 = vpop.f32.mrb[57].mxu1  ;;  %v1089_v17 = vmul.f32 0.5, %v3718_v11  ;;  %v1478_v31 = vmul.f32 0.70710677, %v3824_v4  ;;  %v1409_v61 = vmul.f32 0.5, %v3742_v5 }
 0x14e   :  { %4408 = vst [vmem:[#allocation2_spill] sm:$0xff] %v3820_v57  ;;  %4409 = vst [vmem:[#allocation3_spill] sm:$0xff] %v3830_v7  ;;  %v2498_v34 = vpop.eup %2497  ;;  %v1663_v23 = vmul.f32 %v1599_v3, %v1407_v45  ;;  %v1157_v58 = vmul.f32 0.70710677, %v3828_v25  ;;  %v1477_v3 = vmul.f32 0.70710677, %v3838_v14 }
 0x14f   :  { %v2500_v40 = vpop.eup %2499  ;;  %1727 = vst.msk [vmem:[%s4407_s4 + $0x200] sm:$0xff] %vm90_vm0, %v1343_v39  ;;  %v1282_v9 = vadd.f32 1.0, %v2498_v34  ;;  %v1092_v39 = vmul.f32 0.5, %v3752_v27  ;;  %2515 = verf.f32 %v1478_v31  ;;  %v3874_v27 = vadd.f32 %v3612_v35, %v3545_v15 }
 0x150   :  { %v3851_v45 = vpop.f32.mrb[58].mxu0  ;;  %v2502_v41 = vpop.eup %2501  ;;  %1989 = vst.msk [vmem:[%s4407_s4 + $0x210] sm:$0xff] %vm90_vm0, %v1663_v23  ;;  %v1602_v42 = vadd.f32 1.0, %v2500_v40  ;;  %2517 = verf.f32 %v1157_v58  ;;  %v1160_v23 = vmul.f32 0.70710677, %v3842_v2 }
 0x151   :  { %4410 = vst [vmem:[#allocation4_spill] sm:$0xff] %v3851_v45  ;;  %v2504_v56 = vpop.eup %2503  ;;  %v1346_v43 = vmul.f32 %v1282_v9, %v1090_v60  ;;  %v1281_v11 = vadd.f32 1.0, %v2502_v41  ;;  %v3861_v34 = vpop.f32.mrb[58].mxu1  ;;  %2519 = verf.f32 %v1477_v3  ;;  %v3878_v9 = vadd.f32 %v3612_v35, %v3547_v38 }
 0x152   :  { %v3863_v45 = vpop.f32.mrb[59].mxu0  ;;  %v1666_v7 = vmul.f32 %v1602_v42, %v1410_v36  ;;  %v1601_v57 = vadd.f32 1.0, %v2504_v56  ;;  %v3866_v5 = vpop.f32.mrb[59].mxu1  ;;  %2521 = verf.f32 %v1160_v23  ;;  %v1412_v38 = vmul.f32 0.5, %v3756_v28 }
 0x153   :  { %v2506_v40 = vpop.eup %2505  ;;  %1730 = vst.msk [vmem:[%s4407_s4 + $0x228] sm:$0xff] %vm90_vm0, %v1346_v43  ;;  %v1345_v60 = vmul.f32 %v1281_v11, %v1089_v17  ;;  %v3888_v17 = vadd.f32 %v3612_v35, %v3555_v22  ;;  %v1411_v43 = vmul.f32 0.5, %v3794_v48  ;;  %v1159_v11 = vmul.f32 0.70710677, %v3878_v9 }
 0x154   :  { %v3880_v36 = vpop.f32.mrb[60].mxu0  ;;  %v2508_v31 = vpop.eup %2507  ;;  %1992 = vst.msk [vmem:[%s4407_s4 + $0x238] sm:$0xff] %vm90_vm0, %v1666_v7  ;;  %v1665_v41 = vmul.f32 %v1601_v57, %v1409_v61  ;;  %v1284_v42 = vadd.f32 1.0, %v2506_v40  ;;  %v1091_v57 = vmul.f32 0.5, %v3782_v59  ;;  %v1480_v7 = vmul.f32 0.70710677, %v3874_v27 }
 0x155   :  { %v3890_v15 = vpop.f32.mrb[60].mxu1  ;;  %v3892_v58 = vpop.f32.mrb[61].mxu0  ;;  %1729 = vst.msk [vmem:[%s4407_s4 + $0x220] sm:$0xff] %vm90_vm0, %v1345_v60  ;;  %v1604_v3 = vadd.f32 1.0, %v2508_v31  ;;  %v1479_v28 = vmul.f32 0.70710677, %v3888_v17  ;;  %v3912_v60 = vadd.f32 %v3612_v35, %v3559_v21 }
 0x156   :  { %v3901_v61 = vpop.f32.mrb[61].mxu1  ;;  %v2510_v22 = vpop.eup %2509  ;;  %1991 = vst.msk [vmem:[%s4407_s4 + $0x230] sm:$0xff] %vm90_vm0, %v1665_v41  ;;  %v1348_v56 = vmul.f32 %v1284_v42, %v1092_v39  ;;  %2523 = verf.f32 %v1480_v7  ;;  %v3922_v39 = vadd.f32 %v3612_v35, %v3571_v30  ;;  %v3926_v41 = vadd.f32 %v3612_v35, %v3573_v53 }
 0x157   :  { %4411 = vst [vmem:[#allocation5_spill] sm:$0xff] %v3901_v61  ;;  %v2512_v23 = vpop.eup %2511  ;;  %v1668_v40 = vmul.f32 %v1604_v3, %v1412_v38  ;;  %v1283_v59 = vadd.f32 1.0, %v2510_v22  ;;  %2525 = verf.f32 %v1159_v11  ;;  %v1094_v3 = vmul.f32 0.5, %v3798_v20 }
 0x158   :  { %v3914_v31 = vpop.f32.mrb[62].mxu0  ;;  %v2514_v61 = vpop.eup %2513  ;;  %1732 = vst.msk [vmem:[%s4407_s4 + $0x248] sm:$0xff] %vm90_vm0, %v1348_v56  ;;  %v1603_v48 = vadd.f32 1.0, %v2512_v23  ;;  %2527 = verf.f32 %v1479_v28  ;;  %v1414_v53 = vmul.f32 0.5, %v3824_v4  ;;  %v1162_v56 = vmul.f32 0.70710677, %v3912_v60 }
 0x159   :  { %v3928_v21 = vpop.f32.mrb[62].mxu1  ;;  %v3930_v42 = vpop.f32.mrb[63].mxu0  ;;  %1994 = vst.msk [vmem:[%s4407_s4 + $0x258] sm:$0xff] %vm90_vm0, %v1668_v40  ;;  %v1347_v38 = vmul.f32 %v1283_v59, %v1091_v57  ;;  %v1286_v7 = vadd.f32 1.0, %v2514_v61  ;;  %v1482_v11 = vmul.f32 0.70710677, %v3922_v39  ;;  %v3958_v40 = vadd.f32 %v3612_v35, %v3602_v18 }
 0x15a   :  { %v3937_v30 = vpop.f32.mrb[63].mxu1  ;;  %v1667_v22 = vmul.f32 %v1603_v48, %v1411_v43  ;;  %v2516_v23 = vpop.eup %2515  ;;  %v1093_v20 = vmul.f32 0.5, %v3828_v25  ;;  %v1161_v61 = vmul.f32 0.70710677, %v3926_v41  ;;  %v3950_v43 = vadd.f32 %v3612_v35, %v3587_v62 }
 0x15b   :  { %1731 = vst.msk [vmem:[%s4407_s4 + $0x240] sm:$0xff] %vm90_vm0, %v1347_v38  ;;  %v1350_v57 = vmul.f32 %v1286_v7, %v1094_v3  ;;  %v2518_v4 = vpop.eup %2517  ;;  %v1606_v28 = vadd.f32 1.0, %v2516_v23  ;;  %2529 = verf.f32 %v1162_v56  ;;  %v3962_v25 = vadd.f32 %v3612_v35, %v3605_v52 }
 0x15c   :  { %1993 = vst.msk [vmem:[%s4407_s4 + $0x250] sm:$0xff] %vm90_vm0, %v1667_v22  ;;  %v2520_v59 = vpop.eup %2519  ;;  %v1285_v62 = vadd.f32 1.0, %v2518_v4  ;;  %v1413_v48 = vmul.f32 0.5, %v3838_v14  ;;  %2531 = verf.f32 %v1482_v11  ;;  %v1481_v38 = vmul.f32 0.70710677, %v3950_v43 }
 0x15d   :  { %1734 = vst.msk [vmem:[%s4407_s4 + $0x268] sm:$0xff] %vm90_vm0, %v1350_v57  ;;  %v2522_v3 = vpop.eup %2521  ;;  %v1670_v7 = vmul.f32 %v1606_v28, %v1414_v53  ;;  %v1605_v18 = vadd.f32 1.0, %v2520_v59  ;;  %v1096_v22 = vmul.f32 0.5, %v3842_v2  ;;  %2533 = verf.f32 %v1161_v61 }
 0x15e   :  { %v1349_v52 = vmul.f32 %v1285_v62, %v1093_v20  ;;  %v1288_v56 = vadd.f32 1.0, %v2522_v3  ;;  %2535 = verf.f32 %v1481_v38  ;;  %v1164_v23 = vmul.f32 0.70710677, %v3958_v40 }
 0x15f   :  { %1996 = vst.msk [vmem:[%s4407_s4 + $0x278] sm:$0xff] %vm90_vm0, %v1670_v7  ;;  %v1669_v14 = vmul.f32 %v1605_v18, %v1413_v48  ;;  %v1416_v11 = vmul.f32 0.5, %v3874_v27  ;;  %v1484_v57 = vmul.f32 0.70710677, %v3962_v25  ;;  %v3980_v53 = vadd.f32 %v3612_v35, %v3607_v8 }
 0x160   :  { %v2524_v2 = vpop.eup %2523  ;;  %1733 = vst.msk [vmem:[%s4407_s4 + $0x260] sm:$0xff] %vm90_vm0, %v1349_v52  ;;  %v1352_v20 = vmul.f32 %v1288_v56, %v1096_v22  ;;  %2537 = verf.f32 %v1164_v23  ;;  %v3988_v61 = vadd.f32 %v3612_v35, %v3622_v24  ;;  %v3992_v27 = vadd.f32 %v3612_v35, %v3643_v12 }
 0x161   :  { %v2526_v4 = vpop.eup %2525  ;;  %1995 = vst.msk [vmem:[%s4407_s4 + $0x270] sm:$0xff] %vm90_vm0, %v1669_v14  ;;  %v1608_v8 = vadd.f32 1.0, %v2524_v2  ;;  %v1095_v28 = vmul.f32 0.5, %v3878_v9  ;;  %2539 = verf.f32 %v1484_v57  ;;  %v1163_v59 = vmul.f32 0.70710677, %v3980_v53 }
 0x162   :  { %v2528_v62 = vpop.eup %2527  ;;  %1736 = vst.msk [vmem:[%s4407_s4 + $0x288] sm:$0xff] %vm90_vm0, %v1352_v20  ;;  %v1287_v24 = vadd.f32 1.0, %v2526_v4  ;;  %v1415_v12 = vmul.f32 0.5, %v3888_v17  ;;  %v1098_v48 = vmul.f32 0.5, %v3912_v60  ;;  %v1483_v38 = vmul.f32 0.70710677, %v3988_v61 }
 0x163   :  { %v1672_v3 = vmul.f32 %v1608_v8, %v1416_v11  ;;  %v1607_v7 = vadd.f32 1.0, %v2528_v62  ;;  %2541 = verf.f32 %v1163_v59  ;;  %v1166_v9 = vmul.f32 0.70710677, %v3992_v27 }
 0x164   :  { %v1351_v18 = vmul.f32 %v1287_v24, %v1095_v28  ;;  %2543 = verf.f32 %v1483_v38  ;;  %v4010_v22 = vadd.f32 %v3612_v35, %v3653_v46  ;;  %v4014_v52 = vadd.f32 %v3612_v35, %v3655_v6 }
 0x165   :  { %v2530_v17 = vpop.eup %2529  ;;  %1998 = vst.msk [vmem:[%s4407_s4 + $0x298] sm:$0xff] %vm90_vm0, %v1672_v3  ;;  %v1671_v60 = vmul.f32 %v1607_v7, %v1415_v12  ;;  %2545 = verf.f32 %v1166_v9  ;;  %v4022_v56 = vadd.f32 %v3612_v35, %v3658_v54  ;;  %v4026_v46 = vadd.f32 %v3612_v35, %v3672_v49 }
 0x166   :  { %v2532_v23 = vpop.eup %2531  ;;  %1735 = vst.msk [vmem:[%s4407_s4 + $0x280] sm:$0xff] %vm90_vm0, %v1351_v18  ;;  %v1290_v6 = vadd.f32 1.0, %v2530_v17  ;;  %v1418_v14 = vmul.f32 0.5, %v3922_v39  ;;  %v1097_v11 = vmul.f32 0.5, %v3926_v41  ;;  %v1486_v57 = vmul.f32 0.70710677, %v4010_v22 }
 0x167   :  { %v2534_v2 = vpop.eup %2533  ;;  %1997 = vst.msk [vmem:[%s4407_s4 + $0x290] sm:$0xff] %vm90_vm0, %v1671_v60  ;;  %v1610_v54 = vadd.f32 1.0, %v2532_v23  ;;  %v1417_v49 = vmul.f32 0.5, %v3950_v43  ;;  %v1165_v20 = vmul.f32 0.70710677, %v4014_v52  ;;  %v1100_v41 = vmul.f32 0.5, %v3958_v40 }
 0x168   :  { %v1485_v4 = vmul.f32 0.70710677, %v4022_v56  ;;  %v2536_v8 = vpop.eup %2535  ;;  %v1354_v28 = vmul.f32 %v1290_v6, %v1098_v48  ;;  %v1289_v39 = vadd.f32 1.0, %v2534_v2  ;;  %2547 = verf.f32 %v1486_v57 }
 0x169   :  { %v1674_v59 = vmul.f32 %v1610_v54, %v1418_v14  ;;  %v1609_v62 = vadd.f32 1.0, %v2536_v8  ;;  %2549 = verf.f32 %v1165_v20  ;;  %v1168_v24 = vmul.f32 0.70710677, %v4026_v46 }
 0x16a   :  { %v2538_v12 = vpop.eup %2537  ;;  %1738 = vst.msk [vmem:[%s4407_s4 + $0x2a8] sm:$0xff] %vm90_vm0, %v1354_v28  ;;  %v1353_v43 = vmul.f32 %v1289_v39, %v1097_v11  ;;  %2551 = verf.f32 %v1485_v4  ;;  %v4050_v48 = vadd.f32 %v3612_v35, %v3682_v44  ;;  %v4054_v40 = vadd.f32 %v3612_v35, %v3684_v37 }
 0x16b   :  { %v2540_v38 = vpop.eup %2539  ;;  %2000 = vst.msk [vmem:[%s4407_s4 + $0x2b8] sm:$0xff] %vm90_vm0, %v1674_v59  ;;  %v1673_v3 = vmul.f32 %v1609_v62, %v1417_v49  ;;  %v1292_v7 = vadd.f32 1.0, %v2538_v12  ;;  %2553 = verf.f32 %v1168_v24  ;;  %v4062_v9 = vadd.f32 %v3612_v35, %v3693_v19 }
 0x16c   :  { %1737 = vst.msk [vmem:[%s4407_s4 + $0x2a0] sm:$0xff] %vm90_vm0, %v1353_v43  ;;  %v1420_v44 = vmul.f32 0.5, %v3962_v25  ;;  %v1612_v37 = vadd.f32 1.0, %v2540_v38  ;;  %v1099_v18 = vmul.f32 0.5, %v3980_v53  ;;  %v1488_v17 = vmul.f32 0.70710677, %v4050_v48 }
 0x16d   :  { %v2542_v60 = vpop.eup %2541  ;;  %1999 = vst.msk [vmem:[%s4407_s4 + $0x2b0] sm:$0xff] %vm90_vm0, %v1673_v3  ;;  %v1356_v19 = vmul.f32 %v1292_v7, %v1100_v41  ;;  %v1419_v23 = vmul.f32 0.5, %v3988_v61  ;;  %v1167_v6 = vmul.f32 0.70710677, %v4054_v40  ;;  %v1487_v14 = vmul.f32 0.70710677, %v4062_v9 }
 0x16e   :  { %v2544_v11 = vpop.eup %2543  ;;  %v1676_v25 = vmul.f32 %v1612_v37, %v1420_v44  ;;  %v1291_v57 = vadd.f32 1.0, %v2542_v60  ;;  %2555 = verf.f32 %v1488_v17  ;;  %v4080_v53 = vadd.f32 %v3612_v35, %v3706_v55 }
 0x16f   :  { %v2546_v2 = vpop.eup %2545  ;;  %1740 = vst.msk [vmem:[%s4407_s4 + $0x2c8] sm:$0xff] %vm90_vm0, %v1356_v19  ;;  %v1611_v54 = vadd.f32 1.0, %v2544_v11  ;;  %2557 = verf.f32 %v1167_v6  ;;  %v4088_v61 = vadd.f32 %v3612_v35, %v3720_v50  ;;  %v4092_v49 = vadd.f32 %v3612_v35, %v3722_v13 }
 0x170   :  { %2002 = vst.msk [vmem:[%s4407_s4 + $0x2d8] sm:$0xff] %vm90_vm0, %v1676_v25  ;;  %v1355_v55 = vmul.f32 %v1291_v57, %v1099_v18  ;;  %v1102_v20 = vmul.f32 0.5, %v3992_v27  ;;  %v1294_v4 = vadd.f32 1.0, %v2546_v2  ;;  %2559 = verf.f32 %v1487_v14 }
 0x171   :  { %v1675_v8 = vmul.f32 %v1611_v54, %v1419_v23  ;;  %v1422_v28 = vmul.f32 0.5, %v4010_v22  ;;  %v1170_v50 = vmul.f32 0.70710677, %v4080_v53  ;;  %v1490_v39 = vmul.f32 0.70710677, %v4088_v61 }
 0x172   :  { %v2548_v41 = vpop.eup %2547  ;;  %1739 = vst.msk [vmem:[%s4407_s4 + $0x2c0] sm:$0xff] %vm90_vm0, %v1355_v55  ;;  %v1358_v13 = vmul.f32 %v1294_v4, %v1102_v20  ;;  %v1101_v59 = vmul.f32 0.5, %v4014_v52  ;;  %v1169_v27 = vmul.f32 0.70710677, %v4092_v49  ;;  %v4110_v62 = vadd.f32 %v3612_v35, %v3729_v63 }
 0x173   :  { %v2550_v22 = vpop.eup %2549  ;;  %2001 = vst.msk [vmem:[%s4407_s4 + $0x2d0] sm:$0xff] %vm90_vm0, %v1675_v8  ;;  %v1614_v24 = vadd.f32 1.0, %v2548_v41  ;;  %2561 = verf.f32 %v1170_v50  ;;  %v4118_v12 = vadd.f32 %v3612_v35, %v3744_v47  ;;  %v4122_v52 = vadd.f32 %v3612_v35, %v3758_v29 }
 0x174   :  { %v2552_v43 = vpop.eup %2551  ;;  %1742 = vst.msk [vmem:[%s4407_s4 + $0x2e8] sm:$0xff] %vm90_vm0, %v1358_v13  ;;  %v1293_v63 = vadd.f32 1.0, %v2550_v22  ;;  %v1421_v38 = vmul.f32 0.5, %v4022_v56  ;;  %2563 = verf.f32 %v1490_v39  ;;  %v1489_v3 = vmul.f32 0.70710677, %v4110_v62 }
 0x175   :  { %v2554_v7 = vpop.eup %2553  ;;  %v1678_v44 = vmul.f32 %v1614_v24, %v1422_v28  ;;  %v1613_v47 = vadd.f32 1.0, %v2552_v43  ;;  %v1104_v37 = vmul.f32 0.5, %v4026_v46  ;;  %2565 = verf.f32 %v1169_v27 }
 0x176   :  { %v1357_v29 = vmul.f32 %v1293_v63, %v1101_v59  ;;  %v1296_v18 = vadd.f32 1.0, %v2554_v7  ;;  %2567 = verf.f32 %v1489_v3  ;;  %v1172_v17 = vmul.f32 0.70710677, %v4118_v12 }
 0x177   :  { %2004 = vst.msk [vmem:[%s4407_s4 + $0x2f8] sm:$0xff] %vm90_vm0, %v1678_v44  ;;  %v1677_v56 = vmul.f32 %v1613_v47, %v1421_v38  ;;  %v1424_v60 = vmul.f32 0.5, %v4050_v48  ;;  %v1492_v19 = vmul.f32 0.70710677, %v4122_v52  ;;  %v4140_v23 = vadd.f32 %v3612_v35, %v3760_v51 }
 0x178   :  { %v2556_v46 = vpop.eup %2555  ;;  %1741 = vst.msk [vmem:[%s4407_s4 + $0x2e0] sm:$0xff] %vm90_vm0, %v1357_v29  ;;  %v1360_v6 = vmul.f32 %v1296_v18, %v1104_v37  ;;  %2569 = verf.f32 %v1172_v17  ;;  %v4148_v14 = vadd.f32 %v3612_v35, %v3768_v32  ;;  %v4152_v48 = vadd.f32 %v3612_v35, %v3772_v0  ;;  %v4412_v29 = vld [vmem:[#allocation2_spill] sm:$0xff] }
 0x179   :  { %v2558_v11 = vpop.eup %2557  ;;  %2003 = vst.msk [vmem:[%s4407_s4 + $0x2f0] sm:$0xff] %vm90_vm0, %v1677_v56  ;;  %v1616_v51 = vadd.f32 1.0, %v2556_v46  ;;  %v1103_v25 = vmul.f32 0.5, %v4054_v40  ;;  %2571 = verf.f32 %v1492_v19  ;;  %v1171_v57 = vmul.f32 0.70710677, %v4140_v23 }
 0x17a   :  { %v2560_v2 = vpop.eup %2559  ;;  %1744 = vst.msk [vmem:[%s4407_s4 + $0x308] sm:$0xff] %vm90_vm0, %v1360_v6  ;;  %v1295_v32 = vadd.f32 1.0, %v2558_v11  ;;  %v1423_v0 = vmul.f32 0.5, %v4062_v9  ;;  %v1106_v54 = vmul.f32 0.5, %v4080_v53  ;;  %v1491_v55 = vmul.f32 0.70710677, %v4148_v14 }
 0x17b   :  { %v1680_v20 = vmul.f32 %v1616_v51, %v1424_v60  ;;  %v1615_v4 = vadd.f32 1.0, %v2560_v2  ;;  %2573 = verf.f32 %v1171_v57  ;;  %v1174_v40 = vmul.f32 0.70710677, %v4152_v48  ;;  %v4413_v60 = vld [vmem:[#allocation3_spill] sm:$0xff] }
 0x17c   :  { %v1359_v8 = vmul.f32 %v1295_v32, %v1103_v25  ;;  %2575 = verf.f32 %v1491_v55  ;;  %v4170_v28 = vadd.f32 %v3612_v35, %v3784_v33  ;;  %v4174_v50 = vadd.f32 %v3612_v35, %v3786_v16 }
 0x17d   :  { %v2562_v9 = vpop.eup %2561  ;;  %2006 = vst.msk [vmem:[%s4407_s4 + $0x318] sm:$0xff] %vm90_vm0, %v1680_v20  ;;  %v1679_v53 = vmul.f32 %v1615_v4, %v1423_v0  ;;  %2577 = verf.f32 %v1174_v40  ;;  %v4182_v39 = vadd.f32 %v3612_v35, %v3800_v10  ;;  %v4186_v33 = vadd.f32 %v3612_v35, %v3815_v26 }
 0x17e   :  { %v2564_v41 = vpop.eup %2563  ;;  %1743 = vst.msk [vmem:[%s4407_s4 + $0x300] sm:$0xff] %vm90_vm0, %v1359_v8  ;;  %v1298_v16 = vadd.f32 1.0, %v2562_v9  ;;  %v1426_v13 = vmul.f32 0.5, %v4088_v61  ;;  %v1105_v59 = vmul.f32 0.5, %v4092_v49  ;;  %v1494_v27 = vmul.f32 0.70710677, %v4170_v28 }
 0x17f   :  { %v2566_v22 = vpop.eup %2565  ;;  %2005 = vst.msk [vmem:[%s4407_s4 + $0x310] sm:$0xff] %vm90_vm0, %v1679_v53  ;;  %v1618_v10 = vadd.f32 1.0, %v2564_v41  ;;  %v1425_v26 = vmul.f32 0.5, %v4110_v62  ;;  %v1173_v24 = vmul.f32 0.70710677, %v4174_v50  ;;  %v1108_v49 = vmul.f32 0.5, %v4118_v12 }
 0x180   :  { %v1493_v43 = vmul.f32 0.70710677, %v4182_v39  ;;  %v2568_v63 = vpop.eup %2567  ;;  %v1362_v38 = vmul.f32 %v1298_v16, %v1106_v54  ;;  %v1297_v61 = vadd.f32 1.0, %v2566_v22  ;;  %2579 = verf.f32 %v1494_v27 }
 0x181   :  { %v1682_v3 = vmul.f32 %v1618_v10, %v1426_v13  ;;  %v1617_v7 = vadd.f32 1.0, %v2568_v63  ;;  %2581 = verf.f32 %v1173_v24  ;;  %v1176_v44 = vmul.f32 0.70710677, %v4186_v33 }
 0x182   :  { %v2570_v47 = vpop.eup %2569  ;;  %1746 = vst.msk [vmem:[%s4407_s4 + $0x328] sm:$0xff] %vm90_vm0, %v1362_v38  ;;  %v1361_v62 = vmul.f32 %v1297_v61, %v1105_v59  ;;  %2583 = verf.f32 %v1493_v43  ;;  %v4210_v37 = vadd.f32 %v3612_v35, %v3818_v1  ;;  %v4214_v12 = vadd.f32 %v3612_v35, %v4412_v29  ;;  %v4415_v29 = vld [vmem:[#allocation5_spill] sm:$0xff] }
 0x183   :  { %v2572_v18 = vpop.eup %2571  ;;  %2008 = vst.msk [vmem:[%s4407_s4 + $0x338] sm:$0xff] %vm90_vm0, %v1682_v3  ;;  %v1681_v17 = vmul.f32 %v1617_v7, %v1425_v26  ;;  %v1300_v56 = vadd.f32 1.0, %v2570_v47  ;;  %2585 = verf.f32 %v1176_v44  ;;  %v4222_v19 = vadd.f32 %v3612_v35, %v4413_v60  ;;  %v2618_v44 = vld [vmem:[%s4406_s3] ss:$0 sm:$0xff] }
 0x184   :  { %1745 = vst.msk [vmem:[%s4407_s4 + $0x320] sm:$0xff] %vm90_vm0, %v1361_v62  ;;  %v1428_v1 = vmul.f32 0.5, %v4122_v52  ;;  %v1620_v46 = vadd.f32 1.0, %v2572_v18  ;;  %v1107_v6 = vmul.f32 0.5, %v4140_v23  ;;  %v1496_v11 = vmul.f32 0.70710677, %v4210_v37 }
 0x185   :  { %v2574_v51 = vpop.eup %2573  ;;  %2007 = vst.msk [vmem:[%s4407_s4 + $0x330] sm:$0xff] %vm90_vm0, %v1681_v17  ;;  %v1364_v25 = vmul.f32 %v1300_v56, %v1108_v49  ;;  %v1427_v57 = vmul.f32 0.5, %v4148_v14  ;;  %v1175_v2 = vmul.f32 0.70710677, %v4214_v12  ;;  %v1495_v32 = vmul.f32 0.70710677, %v4222_v19 }
 0x186   :  { %v2576_v0 = vpop.eup %2575  ;;  %v1684_v52 = vmul.f32 %v1620_v46, %v1428_v1  ;;  %v1299_v54 = vadd.f32 1.0, %v2574_v51  ;;  %2587 = verf.f32 %v1496_v11  ;;  %v4414_v23 = vld [vmem:[#allocation4_spill] sm:$0xff]  ;;  %v4248_v14 = vadd.f32 %v3612_v35, %v3861_v34 }
 0x187   :  { %v4240_v55 = vadd.f32 %v3612_v35, %v4414_v23  ;;  %v2578_v20 = vpop.eup %2577  ;;  %1748 = vst.msk [vmem:[%s4407_s4 + $0x348] sm:$0xff] %vm90_vm0, %v1364_v25  ;;  %v1619_v4 = vadd.f32 1.0, %v2576_v0  ;;  %2589 = verf.f32 %v1175_v2  ;;  %v4252_v40 = vadd.f32 %v3612_v35, %v3863_v45 }
 0x188   :  { %2010 = vst.msk [vmem:[%s4407_s4 + $0x358] sm:$0xff] %vm90_vm0, %v1684_v52  ;;  %v1363_v8 = vmul.f32 %v1299_v54, %v1107_v6  ;;  %v1110_v9 = vmul.f32 0.5, %v4152_v48  ;;  %v1302_v53 = vadd.f32 1.0, %v2578_v20  ;;  %2591 = verf.f32 %v1495_v32 }
 0x189   :  { %v1683_v41 = vmul.f32 %v1619_v4, %v1427_v57  ;;  %v1430_v16 = vmul.f32 0.5, %v4170_v28  ;;  %v1178_v34 = vmul.f32 0.70710677, %v4240_v55  ;;  %v1498_v13 = vmul.f32 0.70710677, %v4248_v14 }
 0x18a   :  { %v2580_v59 = vpop.eup %2579  ;;  %1747 = vst.msk [vmem:[%s4407_s4 + $0x340] sm:$0xff] %vm90_vm0, %v1363_v8  ;;  %v1366_v45 = vmul.f32 %v1302_v53, %v1110_v9  ;;  %v1109_v27 = vmul.f32 0.5, %v4174_v50  ;;  %v1177_v48 = vmul.f32 0.70710677, %v4252_v40  ;;  %v4270_v22 = vadd.f32 %v3612_v35, %v3866_v5 }
 0x18b   :  { %v2582_v28 = vpop.eup %2581  ;;  %2009 = vst.msk [vmem:[%s4407_s4 + $0x350] sm:$0xff] %vm90_vm0, %v1683_v41  ;;  %v1622_v10 = vadd.f32 1.0, %v2580_v59  ;;  %2593 = verf.f32 %v1178_v34  ;;  %v4278_v26 = vadd.f32 %v3612_v35, %v3880_v36  ;;  %v4282_v50 = vadd.f32 %v3612_v35, %v3890_v15 }
 0x18c   :  { %v2584_v24 = vpop.eup %2583  ;;  %1750 = vst.msk [vmem:[%s4407_s4 + $0x368] sm:$0xff] %vm90_vm0, %v1366_v45  ;;  %v1301_v5 = vadd.f32 1.0, %v2582_v28  ;;  %v1429_v43 = vmul.f32 0.5, %v4182_v39  ;;  %2595 = verf.f32 %v1498_v13  ;;  %v1497_v63 = vmul.f32 0.70710677, %v4270_v22 }
 0x18d   :  { %v2586_v38 = vpop.eup %2585  ;;  %v1686_v61 = vmul.f32 %v1622_v10, %v1430_v16  ;;  %v1621_v36 = vadd.f32 1.0, %v2584_v24  ;;  %v1112_v49 = vmul.f32 0.5, %v4186_v33  ;;  %2597 = verf.f32 %v1177_v48 }
 0x18e   :  { %v1365_v35 = vmul.f32 %v1301_v5, %v1109_v27  ;;  %v1304_v15 = vadd.f32 1.0, %v2586_v38  ;;  %2599 = verf.f32 %v1497_v63  ;;  %v1180_v3 = vmul.f32 0.70710677, %v4278_v26 }
 0x18f   :  { %2012 = vst.msk [vmem:[%s4407_s4 + $0x378] sm:$0xff] %vm90_vm0, %v1686_v61  ;;  %v1685_v39 = vmul.f32 %v1621_v36, %v1429_v43  ;;  %v1500_v7 = vmul.f32 0.70710677, %v4282_v50  ;;  %v4301_v33 = vadd.f32 %v2618_v44, %v3892_v58  ;;  %v4308_v18 = vadd.f32 %v2618_v44, %v4415_v29 }
 0x190   :  { %v2588_v47 = vpop.eup %2587  ;;  %1749 = vst.msk [vmem:[%s4407_s4 + $0x360] sm:$0xff] %vm90_vm0, %v1365_v35  ;;  %v1368_v62 = vmul.f32 %v1304_v15, %v1112_v49  ;;  %2601 = verf.f32 %v1180_v3  ;;  %v4311_v17 = vadd.f32 %v2618_v44, %v3914_v31  ;;  %v1432_v58 = vmul.f32 0.5, %v4210_v37 }
 0x191   :  { %v2590_v56 = vpop.eup %2589  ;;  %2011 = vst.msk [vmem:[%s4407_s4 + $0x370] sm:$0xff] %vm90_vm0, %v1685_v39  ;;  %v1624_v60 = vadd.f32 1.0, %v2588_v47  ;;  %2603 = verf.f32 %v1500_v7  ;;  %v1179_v1 = vmul.f32 0.70710677, %v4301_v33  ;;  %v1111_v31 = vmul.f32 0.5, %v4214_v12 }
 0x192   :  { %v2592_v46 = vpop.eup %2591  ;;  %1752 = vst.msk [vmem:[%s4407_s4 + $0x388] sm:$0xff] %vm90_vm0, %v1368_v62  ;;  %v1303_v6 = vadd.f32 1.0, %v2590_v56  ;;  %v1431_v11 = vmul.f32 0.5, %v4222_v19  ;;  %v1499_v51 = vmul.f32 0.70710677, %v4308_v18  ;;  %v1052_v32 = vadd.f32 %v2618_v44, %v3928_v21 }
 0x193   :  { %v1688_v25 = vmul.f32 %v1624_v60, %v1432_v58  ;;  %v1623_v57 = vadd.f32 1.0, %v2592_v46  ;;  %2605 = verf.f32 %v1179_v1  ;;  %v1182_v37 = vmul.f32 0.70710677, %v4311_v17 }
 0x194   :  { %v1367_v2 = vmul.f32 %v1303_v6, %v1111_v31  ;;  %2607 = verf.f32 %v1499_v51  ;;  %v4329_v0 = vadd.f32 %v2618_v44, %v3930_v42  ;;  %v1047_v19 = vadd.f32 %v2618_v44, %v3937_v30 }
 0x195   :  { %v2594_v52 = vpop.eup %2593  ;;  %2014 = vst.msk [vmem:[%s4407_s4 + $0x398] sm:$0xff] %vm90_vm0, %v1688_v25  ;;  %v1687_v12 = vmul.f32 %v1623_v57, %v1431_v11  ;;  %2609 = verf.f32 %v1182_v37  ;;  %v1114_v21 = vmul.f32 0.5, %v4240_v55  ;;  %v1502_v23 = vmul.f32 0.70710677, %v1052_v32 }
 0x196   :  { %v2596_v54 = vpop.eup %2595  ;;  %1751 = vst.msk [vmem:[%s4407_s4 + $0x380] sm:$0xff] %vm90_vm0, %v1367_v2  ;;  %v1306_v42 = vadd.f32 1.0, %v2594_v52  ;;  %v1434_v4 = vmul.f32 0.5, %v4248_v14  ;;  %v1181_v30 = vmul.f32 0.70710677, %v4329_v0  ;;  %v1113_v16 = vmul.f32 0.5, %v4252_v40 }
 0x197   :  { %v2598_v20 = vpop.eup %2597  ;;  %2013 = vst.msk [vmem:[%s4407_s4 + $0x390] sm:$0xff] %vm90_vm0, %v1687_v12  ;;  %v1626_v8 = vadd.f32 1.0, %v2596_v54  ;;  %v1501_v9 = vmul.f32 0.70710677, %v1047_v19  ;;  %2611 = verf.f32 %v1502_v23  ;;  %v1433_v13 = vmul.f32 0.5, %v4270_v22 }
 0x198   :  { %v2600_v53 = vpop.eup %2599  ;;  %v1370_v41 = vmul.f32 %v1306_v42, %v1114_v21  ;;  %v1305_v34 = vadd.f32 1.0, %v2598_v20  ;;  %2613 = verf.f32 %v1181_v30  ;;  %v1116_v48 = vmul.f32 0.5, %v4278_v26 }
 0x199   :  { %v1690_v55 = vmul.f32 %v1626_v8, %v1434_v4  ;;  %v1625_v59 = vadd.f32 1.0, %v2600_v53  ;;  %2615 = verf.f32 %v1501_v9  ;;  %v1436_v28 = vmul.f32 0.5, %v4282_v50 }
 0x19a   :  { %v2602_v45 = vpop.eup %2601  ;;  %1754 = vst.msk [vmem:[%s4407_s4 + $0x3a8] sm:$0xff] %vm90_vm0, %v1370_v41  ;;  %v1369_v14 = vmul.f32 %v1305_v34, %v1113_v16  ;;  %v1115_v26 = vmul.f32 0.5, %v4301_v33  ;;  %v1435_v50 = vmul.f32 0.5, %v4308_v18  ;;  %v1118_v35 = vmul.f32 0.5, %v4311_v17 }
 0x19b   :  { %v2604_v27 = vpop.eup %2603  ;;  %2016 = vst.msk [vmem:[%s4407_s4 + $0x3b8] sm:$0xff] %vm90_vm0, %v1690_v55  ;;  %v1689_v40 = vmul.f32 %v1625_v59, %v1433_v13  ;;  %v1308_v22 = vadd.f32 1.0, %v2602_v45  ;;  %v1438_v33 = vmul.f32 0.5, %v1052_v32  ;;  %v1117_v29 = vmul.f32 0.5, %v4329_v0 }
 0x19c   :  { %1753 = vst.msk [vmem:[%s4407_s4 + $0x3a0] sm:$0xff] %vm90_vm0, %v1369_v14  ;;  %v1628_v10 = vadd.f32 1.0, %v2604_v27  ;;  %v1437_v56 = vmul.f32 0.5, %v1047_v19 }
 0x19d   :  { %v2606_v24 = vpop.eup %2605  ;;  %2015 = vst.msk [vmem:[%s4407_s4 + $0x3b0] sm:$0xff] %vm90_vm0, %v1689_v40  ;;  %v1372_v5 = vmul.f32 %v1308_v22, %v1116_v48 }
 0x19e   :  { %v2608_v43 = vpop.eup %2607  ;;  %v1692_v63 = vmul.f32 %v1628_v10, %v1436_v28  ;;  %v1307_v38 = vadd.f32 1.0, %v2606_v24 }
 0x19f   :  { %v2610_v61 = vpop.eup %2609  ;;  %1756 = vst.msk [vmem:[%s4407_s4 + $0x3c8] sm:$0xff] %vm90_vm0, %v1372_v5  ;;  %v1627_v36 = vadd.f32 1.0, %v2608_v43 }
 0x1a0   :  { %2018 = vst.msk [vmem:[%s4407_s4 + $0x3d8] sm:$0xff] %vm90_vm0, %v1692_v63  ;;  %v1371_v49 = vmul.f32 %v1307_v38, %v1115_v26  ;;  %v1310_v15 = vadd.f32 1.0, %v2610_v61 }
 0x1a1   :  { %v1691_v3 = vmul.f32 %v1627_v36, %v1435_v50  ;;  %v2612_v39 = vpop.eup %2611 }
 0x1a2   :  { %1755 = vst.msk [vmem:[%s4407_s4 + $0x3c0] sm:$0xff] %vm90_vm0, %v1371_v49  ;;  %v1374_v7 = vmul.f32 %v1310_v15, %v1118_v35  ;;  %v2614_v44 = vpop.eup %2613  ;;  %v1630_v47 = vadd.f32 1.0, %v2612_v39 }
 0x1a3   :  { %2017 = vst.msk [vmem:[%s4407_s4 + $0x3d0] sm:$0xff] %vm90_vm0, %v1691_v3  ;;  %v2616_v62 = vpop.eup %2615  ;;  %v1309_v18 = vadd.f32 1.0, %v2614_v44 }
 0x1a4   :  { %1758 = vst.msk [vmem:[%s4407_s4 + $0x3e8] sm:$0xff] %vm90_vm0, %v1374_v7  ;;  %v1694_v17 = vmul.f32 %v1630_v47, %v1438_v33  ;;  %v1629_v58 = vadd.f32 1.0, %v2616_v62 }
 0x1a5   :  { %v1373_v60 = vmul.f32 %v1309_v18, %v1117_v29 }
 0x1a6   :  { %2020 = vst.msk [vmem:[%s4407_s4 + $0x3f8] sm:$0xff] %vm90_vm0, %v1694_v17  ;;  %v1693_v1 = vmul.f32 %v1629_v58, %v1437_v56 }
 0x1a7   :  { %1757 = vst.msk [vmem:[%s4407_s4 + $0x3e0] sm:$0xff] %vm90_vm0, %v1373_v60 }
 0x1a8   :  { %2019 = vst.msk [vmem:[%s4407_s4 + $0x3f0] sm:$0xff] %vm90_vm0, %v1693_v1 }

</bundles_post_ra>
